<compile_context>
chip_gen: v6e
topology: v6e:2x2x1
jax: 0.10.0
libtpu: 0.0.40
codegen_flags: <defaults>
</compile_context>

<pallas_src>
import functools

import jax
import jax.numpy as jnp
import numpy as np
from jax import lax
from jax.experimental import pallas as pl
from jax.experimental.pallas import tpu as pltpu


# ----------------------------------------------------------------------------
# Fused Pallas kernel: encoder + decoder, single invocation, no grid.
# ----------------------------------------------------------------------------
def gconvlstm_kernel(x_ref, a_ref,
                     enc_wx_ref, enc_wh_ref, enc_b_ref,
                     dec0_wh_ref, dec0_wc_ref, dec0_b_ref,
                     dec_wx_ref, dec_wh_ref, dec_b_ref,
                     out_ref,
                     he_sc, ce_sc, hd_sc, cd_sc):
    t_enc = x_ref.shape[0]
    s_dec = out_ref.shape[0]
    hid = he_sc.shape[1]
    out_c = hd_sc.shape[1]

    def _sigmoid(v):
        return 1.0 / (1.0 + jnp.exp(-v))

    def _gates(z, c_prev, w):
        i = _sigmoid(z[:, 0 * w:1 * w])
        f = _sigmoid(z[:, 1 * w:2 * w])
        o = _sigmoid(z[:, 2 * w:3 * w])
        g = jnp.tanh(z[:, 3 * w:4 * w])
        c_next = f * c_prev + i * g
        h_next = o * jnp.tanh(c_next)
        return h_next, c_next

    a = a_ref[...]                      # A_norm stays VMEM/vreg resident
    enc_wx = enc_wx_ref[...]
    enc_wh = enc_wh_ref[...]
    enc_b = enc_b_ref[...]

    # -------------------- encoder recurrence --------------------
    he_sc[...] = jnp.zeros_like(he_sc)
    ce_sc[...] = jnp.zeros_like(ce_sc)

    def enc_body(t, carry):
        # (A @ x_t) @ Wx + (A @ h) @ Wh + b   -- re-associated GCN conv
        ax = jnp.dot(a, x_ref[t], preferred_element_type=jnp.float32)
        ah = jnp.dot(a, he_sc[...], preferred_element_type=jnp.float32)
        z = (jnp.dot(ax, enc_wx, preferred_element_type=jnp.float32)
             + jnp.dot(ah, enc_wh, preferred_element_type=jnp.float32)
             + enc_b)
        h_next, c_next = _gates(z, ce_sc[...], hid)
        he_sc[...] = h_next
        ce_sc[...] = c_next
        return carry

    # Short fixed trip count -> fully unrolled for LLO scheduler visibility.
    lax.fori_loop(0, t_enc, enc_body, 0, unroll=True)

    # -------------------- decoder init + loop-invariant input --------------------
    # A @ h_enc computed once; reused by the ELU init conv AND the loop-invariant
    # decoder input term (the decoder cell input is always the encoder h).
    ah_enc = jnp.dot(a, he_sc[...], preferred_element_type=jnp.float32)
    ac_enc = jnp.dot(a, ce_sc[...], preferred_element_type=jnp.float32)
    z0 = (jnp.dot(ah_enc, dec0_wh_ref[...], preferred_element_type=jnp.float32)
          + jnp.dot(ac_enc, dec0_wc_ref[...], preferred_element_type=jnp.float32)
          + dec0_b_ref[...])
    # ELU(alpha=1), written with exp (avoids relying on expm1 lowering).
    z0 = jnp.where(z0 > 0, z0, jnp.exp(jnp.minimum(z0, 0.0)) - 1.0)
    hd_sc[...] = z0[:, :out_c]
    cd_sc[...] = z0[:, out_c:2 * out_c]

    xin_dec = (jnp.dot(ah_enc, dec_wx_ref[...], preferred_element_type=jnp.float32)
               + dec_b_ref[...])
    dec_wh = dec_wh_ref[...]

    # -------------------- decoder recurrence --------------------
    def dec_body(s, carry):
        ah = jnp.dot(a, hd_sc[...], preferred_element_type=jnp.float32)
        z = jnp.dot(ah, dec_wh, preferred_element_type=jnp.float32) + xin_dec
        h_next, c_next = _gates(z, cd_sc[...], out_c)
        hd_sc[...] = h_next
        cd_sc[...] = c_next
        out_ref[s] = h_next.astype(out_ref.dtype)
        return carry

    lax.fori_loop(0, s_dec, dec_body, 0, unroll=True)


# ----------------------------------------------------------------------------
# Forward pass: a single pallas_call.
# ----------------------------------------------------------------------------
def gconvlstm_seq2seq(params, x_seq, a_norm, dec_seq_len, output_channel):
    """x_seq: [T, N, C_in]  ->  output: [dec_seq_len, N, output_channel]."""
    t_enc, n, c_in = x_seq.shape
    hid = params["enc_wh"].shape[0]
    out_c = params["dec_wh"].shape[0]
    assert out_c == output_channel

    # TODO(synk): for large graphs, cast a_norm / weights to bf16 MXU inputs and
    # row-tile A_norm (v7x has only 64 MiB VMEM); unnecessary at these sizes.
    return pl.pallas_call(
        gconvlstm_kernel,
        out_shape=jax.ShapeDtypeStruct((dec_seq_len, n, output_channel),
                                       jnp.float32),
        scratch_shapes=[
            pltpu.VMEM((n, hid), jnp.float32),    # encoder h
            pltpu.VMEM((n, hid), jnp.float32),    # encoder c
            pltpu.VMEM((n, out_c), jnp.float32),  # decoder h
            pltpu.VMEM((n, out_c), jnp.float32),  # decoder c
        ],
        compiler_params=pltpu.CompilerParams(
            vmem_limit_bytes=32 * 1024 * 1024),
    )(x_seq, a_norm,
      params["enc_wx"], params["enc_wh"], params["enc_b"],
      params["dec0_wh"], params["dec0_wc"], params["dec0_b"],
      params["dec_wx"], params["dec_wh"], params["dec_b"])


# ----------------------------------------------------------------------------
# Model glue (plain JAX): graph normalization and parameter init.
# ----------------------------------------------------------------------------
def build_norm_adj(edge_index, edge_attr, num_nodes):
    """Dense D^-1/2 (A + I) D^-1/2, matching torch_geometric gcn_norm for graphs
    without pre-existing self-loops (add self loops, fill_value=1)."""
    # TODO(synk): the edge_index scatter-add has no clean Pallas TPU equivalent;
    # it stays in plain JAX, only dense math runs inside the kernel.
    src, dst = edge_index[0], edge_index[1]
    a = jnp.zeros((num_nodes, num_nodes), jnp.float32)
    a = a.at[dst, src].add(edge_attr.astype(jnp.float32))  # A[target, source]
    a = a + jnp.eye(num_nodes, dtype=jnp.float32)
    deg = a.sum(axis=1)
    dinv = jnp.where(deg > 0, jax.lax.rsqrt(deg), 0.0)
    return dinv[:, None] * a * dinv[None, :]


def xavier_normal(key, shape):
    fan_in, fan_out = shape[0], shape[1]
    std = float(np.sqrt(2.0 / (fan_in + fan_out)))
    return std * jax.random.normal(key, shape, dtype=jnp.float32)


def init_params(key, input_channels, hidden_channel, output_channel):
    """Logical parameters matching the PyTorch module.  W stored as W^T: [in, out]."""
    k1, k2, k3 = jax.random.split(key, 3)
    w_enc = xavier_normal(k1, (input_channels + hidden_channel, 4 * hidden_channel))
    w_dec0 = xavier_normal(k2, (2 * hidden_channel, 2 * output_channel))
    w_dec = xavier_normal(k3, (hidden_channel + output_channel, 4 * output_channel))
    return {
        "enc_wx": w_enc[:input_channels],
        "enc_wh": w_enc[input_channels:],
        "enc_b": jnp.zeros((1, 4 * hidden_channel), jnp.float32),
        "dec0_wh": w_dec0[:hidden_channel],
        "dec0_wc": w_dec0[hidden_channel:],
        "dec0_b": jnp.zeros((1, 2 * output_channel), jnp.float32),
        "dec_wx": w_dec[:hidden_channel],
        "dec_wh": w_dec[hidden_channel:],
        "dec_b": jnp.zeros((1, 4 * output_channel), jnp.float32),
    }


# ----------------------------------------------------------------------------
# Pure-JAX reference for a sanity check.
# ----------------------------------------------------------------------------
def _ref_cell(x, h, c, a, wx, wh, b):
    z = a @ (x @ wx + h @ wh) + b
    hidn = c.shape[1]
    i = jax.nn.sigmoid(z[:, :hidn])
    f = jax.nn.sigmoid(z[:, hidn:2 * hidn])
    o = jax.nn.sigmoid(z[:, 2 * hidn:3 * hidn])
    g = jnp.tanh(z[:, 3 * hidn:])
    c_n = f * c + i * g
    return o * jnp.tanh(c_n), c_n


def _ref_forward(params, x_seq, a_norm, dec_seq_len, hidden_channel, output_channel):
    n = x_seq.shape[1]
    h = jnp.zeros((n, hidden_channel), x_seq.dtype)
    c = jnp.zeros((n, hidden_channel), x_seq.dtype)
    for t in range(x_seq.shape[0]):
        h, c = _ref_cell(x_seq[t], h, c, a_norm, params["enc_wx"],
                         params["enc_wh"], params["enc_b"])
    z = jax.nn.elu(a_norm @ (h @ params["dec0_wh"] + c @ params["dec0_wc"])
                   + params["dec0_b"])
    h_t, c_t = z[:, :output_channel], z[:, output_channel:]
    outs = []
    for _ in range(dec_seq_len):
        h_t, c_t = _ref_cell(h, h_t, c_t, a_norm, params["dec_wx"],
                             params["dec_wh"], params["dec_b"])
        outs.append(h_t)
    return jnp.stack(outs, axis=0)


# ----------------------------------------------------------------------------
if __name__ == "__main__":
    INPUT_CHANNELS = 4
    HIDDEN_CHANNEL = 8
    OUTPUT_CHANNEL = 8
    NUM_NODES = 16
    ENC_SEQ = 6
    DEC_SEQ = 5

    key = jax.random.PRNGKey(0)
    k_x, k_w, k_e = jax.random.split(key, 3)

    # Input sequence: [seq, num_nodes, input_channels]
    x_seq = jax.random.normal(k_x, (ENC_SEQ, NUM_NODES, INPUT_CHANNELS),
                              dtype=jnp.float32)

    # Ring graph (bidirectional), no self loops.
    src = np.arange(NUM_NODES, dtype=np.int32)
    dst = (src + 1) % NUM_NODES
    edge_index = jnp.asarray(
        np.stack([np.concatenate([src, dst]), np.concatenate([dst, src])], 0))
    edge_attr = jax.random.uniform(k_e, (edge_index.shape[1],),
                                   dtype=jnp.float32, minval=0.5, maxval=1.5)

    a_norm = build_norm_adj(edge_index, edge_attr, NUM_NODES)
    params = init_params(k_w, INPUT_CHANNELS, HIDDEN_CHANNEL, OUTPUT_CHANNEL)

    fwd = jax.jit(functools.partial(gconvlstm_seq2seq,
                                    dec_seq_len=DEC_SEQ,
                                    output_channel=OUTPUT_CHANNEL))
    out = fwd(params, x_seq, a_norm)
    out = jax.block_until_ready(out)
    assert out.shape == (DEC_SEQ, NUM_NODES, OUTPUT_CHANNEL)

    ref = _ref_forward(params, x_seq, a_norm, DEC_SEQ, HIDDEN_CHANNEL,
                       OUTPUT_CHANNEL)
    # (A@X)@W re-association changes rounding order slightly; 5e-3 covers it plus
    # the XLA-vs-Mosaic f32 matmul pass-count difference.
    np.testing.assert_allclose(np.asarray(out), np.asarray(ref),
                               rtol=5e-3, atol=5e-3)

    print("KERNEL_OK")
</pallas_src>

<mosaic_0001>
module attributes {stable_mosaic.version = 11 : i64} {
  func.func @gconvlstm_kernel(%arg0: memref<6x16x4xf32, #tpu.memory_space<vmem>>, %arg1: memref<16x16xf32, #tpu.memory_space<vmem>>, %arg2: memref<4x32xf32, #tpu.memory_space<vmem>>, %arg3: memref<8x32xf32, #tpu.memory_space<vmem>>, %arg4: memref<1x32xf32, #tpu.memory_space<vmem>>, %arg5: memref<8x16xf32, #tpu.memory_space<vmem>>, %arg6: memref<8x16xf32, #tpu.memory_space<vmem>>, %arg7: memref<1x16xf32, #tpu.memory_space<vmem>>, %arg8: memref<8x32xf32, #tpu.memory_space<vmem>>, %arg9: memref<8x32xf32, #tpu.memory_space<vmem>>, %arg10: memref<1x32xf32, #tpu.memory_space<vmem>>, %arg11: memref<5x16x8xf32, #tpu.memory_space<vmem>>, %arg12: memref<16x8xf32, #tpu.memory_space<vmem>>, %arg13: memref<16x8xf32, #tpu.memory_space<vmem>>, %arg14: memref<16x8xf32, #tpu.memory_space<vmem>>, %arg15: memref<16x8xf32, #tpu.memory_space<vmem>>) attributes {dimension_semantics = [], scalar_prefetch = 0 : i64, scratch_operands = 4 : i64, tpu.core_type = #tpu.core_type<tc>} {
    %c0 = arith.constant 0 : index
    %c0_0 = arith.constant 0 : index
    %0 = vector.load %arg1[%c0, %c0_0] : memref<16x16xf32, #tpu.memory_space<vmem>>, vector<16x16xf32>
    %c0_1 = arith.constant 0 : index
    %c0_2 = arith.constant 0 : index
    %1 = vector.load %arg2[%c0_1, %c0_2] : memref<4x32xf32, #tpu.memory_space<vmem>>, vector<4x32xf32>
    %c0_3 = arith.constant 0 : index
    %c0_4 = arith.constant 0 : index
    %2 = vector.load %arg3[%c0_3, %c0_4] : memref<8x32xf32, #tpu.memory_space<vmem>>, vector<8x32xf32>
    %c0_5 = arith.constant 0 : index
    %c0_6 = arith.constant 0 : index
    %3 = vector.load %arg4[%c0_5, %c0_6] : memref<1x32xf32, #tpu.memory_space<vmem>>, vector<1x32xf32>
    %cst = arith.constant 0.000000e+00 : f32
    %4 = vector.broadcast %cst : f32 to vector<16x8xf32>
    %c0_7 = arith.constant 0 : index
    %c0_8 = arith.constant 0 : index
    %5 = vector.load %arg12[%c0_7, %c0_8] : memref<16x8xf32, #tpu.memory_space<vmem>>, vector<16x8xf32>
    tpu.vector_store %arg12[%c0_7, %c0_8], %4 {strides = array<i32>} : memref<16x8xf32, #tpu.memory_space<vmem>>, vector<16x8xf32>,
    %cst_9 = arith.constant 0.000000e+00 : f32
    %6 = vector.broadcast %cst_9 : f32 to vector<16x8xf32>
    %c0_10 = arith.constant 0 : index
    %c0_11 = arith.constant 0 : index
    %7 = vector.load %arg13[%c0_10, %c0_11] : memref<16x8xf32, #tpu.memory_space<vmem>>, vector<16x8xf32>
    tpu.vector_store %arg13[%c0_10, %c0_11], %6 {strides = array<i32>} : memref<16x8xf32, #tpu.memory_space<vmem>>, vector<16x8xf32>,
    %c0_i32 = arith.constant 0 : i32
    %8 = arith.index_cast %c0_i32 : i32 to index
    %c0_12 = arith.constant 0 : index
    %c0_13 = arith.constant 0 : index
    %9 = vector.load %arg0[%8, %c0_12, %c0_13] : memref<6x16x4xf32, #tpu.memory_space<vmem>>, vector<1x16x4xf32>
    %10 = vector.shape_cast %9 : vector<1x16x4xf32> to vector<16x4xf32>
    %cst_14 = arith.constant dense<0.000000e+00> : vector<16x4xf32>
    %11 = tpu.matmul %0, %10, %cst_14 {dimension_numbers = #tpu.dot_dimension_numbers<[1], [0], [0], [1], [0, 0, 1, 1], [], []>} : vector<16x16xf32>, vector<16x4xf32>, vector<16x4xf32> -> vector<16x4xf32>
    %c0_15 = arith.constant 0 : index
    %c0_16 = arith.constant 0 : index
    %12 = vector.load %arg12[%c0_15, %c0_16] : memref<16x8xf32, #tpu.memory_space<vmem>>, vector<16x8xf32>
    %cst_17 = arith.constant dense<0.000000e+00> : vector<16x8xf32>
    %13 = tpu.matmul %0, %12, %cst_17 {dimension_numbers = #tpu.dot_dimension_numbers<[1], [0], [0], [1], [0, 0, 1, 1], [], []>} : vector<16x16xf32>, vector<16x8xf32>, vector<16x8xf32> -> vector<16x8xf32>
    %cst_18 = arith.constant dense<0.000000e+00> : vector<16x32xf32>
    %14 = tpu.matmul %11, %1, %cst_18 {dimension_numbers = #tpu.dot_dimension_numbers<[1], [0], [0], [1], [0, 0, 1, 1], [], []>} : vector<16x4xf32>, vector<4x32xf32>, vector<16x32xf32> -> vector<16x32xf32>
    %cst_19 = arith.constant dense<0.000000e+00> : vector<16x32xf32>
    %15 = tpu.matmul %13, %2, %cst_19 {dimension_numbers = #tpu.dot_dimension_numbers<[1], [0], [0], [1], [0, 0, 1, 1], [], []>} : vector<16x8xf32>, vector<8x32xf32>, vector<16x32xf32> -> vector<16x32xf32>
    %16 = arith.addf %14, %15 : vector<16x32xf32>
    %17 = vector.broadcast %3 : vector<1x32xf32> to vector<16x32xf32>
    %18 = arith.addf %16, %17 : vector<16x32xf32>
    %c0_20 = arith.constant 0 : index
    %c0_21 = arith.constant 0 : index
    %19 = vector.load %arg13[%c0_20, %c0_21] : memref<16x8xf32, #tpu.memory_space<vmem>>, vector<16x8xf32>
    %20 = vector.extract_strided_slice %18 {offsets = [0, 0], sizes = [16, 8], strides = [1, 1]} : vector<16x32xf32> to vector<16x8xf32>
    %cst_22 = arith.constant 0.000000e+00 : f32
    %21 = vector.broadcast %cst_22 : f32 to vector<16x8xf32>
    %22 = arith.subf %21, %20 : vector<16x8xf32>
    %23 = math.exp %22 : vector<16x8xf32>
    %cst_23 = arith.constant 1.000000e+00 : f32
    %24 = vector.broadcast %cst_23 : f32 to vector<16x8xf32>
    %25 = arith.addf %24, %23 : vector<16x8xf32>
    %cst_24 = arith.constant 1.000000e+00 : f32
    %26 = vector.broadcast %cst_24 : f32 to vector<16x8xf32>
    %27 = arith.divf %26, %25 : vector<16x8xf32>
    %28 = vector.extract_strided_slice %18 {offsets = [0, 8], sizes = [16, 8], strides = [1, 1]} : vector<16x32xf32> to vector<16x8xf32>
    %cst_25 = arith.constant 0.000000e+00 : f32
    %29 = vector.broadcast %cst_25 : f32 to vector<16x8xf32>
    %30 = arith.subf %29, %28 : vector<16x8xf32>
    %31 = math.exp %30 : vector<16x8xf32>
    %cst_26 = arith.constant 1.000000e+00 : f32
    %32 = vector.broadcast %cst_26 : f32 to vector<16x8xf32>
    %33 = arith.addf %32, %31 : vector<16x8xf32>
    %cst_27 = arith.constant 1.000000e+00 : f32
    %34 = vector.broadcast %cst_27 : f32 to vector<16x8xf32>
    %35 = arith.divf %34, %33 : vector<16x8xf32>
    %36 = vector.extract_strided_slice %18 {offsets = [0, 16], sizes = [16, 8], strides = [1, 1]} : vector<16x32xf32> to vector<16x8xf32>
    %cst_28 = arith.constant 0.000000e+00 : f32
    %37 = vector.broadcast %cst_28 : f32 to vector<16x8xf32>
    %38 = arith.subf %37, %36 : vector<16x8xf32>
    %39 = math.exp %38 : vector<16x8xf32>
    %cst_29 = arith.constant 1.000000e+00 : f32
    %40 = vector.broadcast %cst_29 : f32 to vector<16x8xf32>
    %41 = arith.addf %40, %39 : vector<16x8xf32>
    %cst_30 = arith.constant 1.000000e+00 : f32
    %42 = vector.broadcast %cst_30 : f32 to vector<16x8xf32>
    %43 = arith.divf %42, %41 : vector<16x8xf32>
    %44 = vector.extract_strided_slice %18 {offsets = [0, 24], sizes = [16, 8], strides = [1, 1]} : vector<16x32xf32> to vector<16x8xf32>
    %45 = math.tanh %44 : vector<16x8xf32>
    %46 = arith.mulf %35, %19 : vector<16x8xf32>
    %47 = arith.mulf %27, %45 : vector<16x8xf32>
    %48 = arith.addf %46, %47 : vector<16x8xf32>
    %49 = math.tanh %48 : vector<16x8xf32>
    %50 = arith.mulf %43, %49 : vector<16x8xf32>
    %c0_31 = arith.constant 0 : index
    %c0_32 = arith.constant 0 : index
    %51 = vector.load %arg12[%c0_31, %c0_32] : memref<16x8xf32, #tpu.memory_space<vmem>>, vector<16x8xf32>
    tpu.vector_store %arg12[%c0_31, %c0_32], %50 {strides = array<i32>} : memref<16x8xf32, #tpu.memory_space<vmem>>, vector<16x8xf32>,
    %c0_33 = arith.constant 0 : index
    %c0_34 = arith.constant 0 : index
    %52 = vector.load %arg13[%c0_33, %c0_34] : memref<16x8xf32, #tpu.memory_space<vmem>>, vector<16x8xf32>
    tpu.vector_store %arg13[%c0_33, %c0_34], %48 {strides = array<i32>} : memref<16x8xf32, #tpu.memory_space<vmem>>, vector<16x8xf32>,
    %c1_i32 = arith.constant 1 : i32
    %53 = arith.index_cast %c1_i32 : i32 to index
    %c0_35 = arith.constant 0 : index
    %c0_36 = arith.constant 0 : index
    %54 = vector.load %arg0[%53, %c0_35, %c0_36] : memref<6x16x4xf32, #tpu.memory_space<vmem>>, vector<1x16x4xf32>
    %55 = vector.shape_cast %54 : vector<1x16x4xf32> to vector<16x4xf32>
    %cst_37 = arith.constant dense<0.000000e+00> : vector<16x4xf32>
    %56 = tpu.matmul %0, %55, %cst_37 {dimension_numbers = #tpu.dot_dimension_numbers<[1], [0], [0], [1], [0, 0, 1, 1], [], []>} : vector<16x16xf32>, vector<16x4xf32>, vector<16x4xf32> -> vector<16x4xf32>
    %c0_38 = arith.constant 0 : index
    %c0_39 = arith.constant 0 : index
    %57 = vector.load %arg12[%c0_38, %c0_39] : memref<16x8xf32, #tpu.memory_space<vmem>>, vector<16x8xf32>
    %cst_40 = arith.constant dense<0.000000e+00> : vector<16x8xf32>
    %58 = tpu.matmul %0, %57, %cst_40 {dimension_numbers = #tpu.dot_dimension_numbers<[1], [0], [0], [1], [0, 0, 1, 1], [], []>} : vector<16x16xf32>, vector<16x8xf32>, vector<16x8xf32> -> vector<16x8xf32>
    %cst_41 = arith.constant dense<0.000000e+00> : vector<16x32xf32>
    %59 = tpu.matmul %56, %1, %cst_41 {dimension_numbers = #tpu.dot_dimension_numbers<[1], [0], [0], [1], [0, 0, 1, 1], [], []>} : vector<16x4xf32>, vector<4x32xf32>, vector<16x32xf32> -> vector<16x32xf32>
    %cst_42 = arith.constant dense<0.000000e+00> : vector<16x32xf32>
    %60 = tpu.matmul %58, %2, %cst_42 {dimension_numbers = #tpu.dot_dimension_numbers<[1], [0], [0], [1], [0, 0, 1, 1], [], []>} : vector<16x8xf32>, vector<8x32xf32>, vector<16x32xf32> -> vector<16x32xf32>
    %61 = arith.addf %59, %60 : vector<16x32xf32>
    %62 = vector.broadcast %3 : vector<1x32xf32> to vector<16x32xf32>
    %63 = arith.addf %61, %62 : vector<16x32xf32>
    %c0_43 = arith.constant 0 : index
    %c0_44 = arith.constant 0 : index
    %64 = vector.load %arg13[%c0_43, %c0_44] : memref<16x8xf32, #tpu.memory_space<vmem>>, vector<16x8xf32>
    %65 = vector.extract_strided_slice %63 {offsets = [0, 0], sizes = [16, 8], strides = [1, 1]} : vector<16x32xf32> to vector<16x8xf32>
    %cst_45 = arith.constant 0.000000e+00 : f32
    %66 = vector.broadcast %cst_45 : f32 to vector<16x8xf32>
    %67 = arith.subf %66, %65 : vector<16x8xf32>
    %68 = math.exp %67 : vector<16x8xf32>
    %cst_46 = arith.constant 1.000000e+00 : f32
    %69 = vector.broadcast %cst_46 : f32 to vector<16x8xf32>
    %70 = arith.addf %69, %68 : vector<16x8xf32>
    %cst_47 = arith.constant 1.000000e+00 : f32
    %71 = vector.broadcast %cst_47 : f32 to vector<16x8xf32>
    %72 = arith.divf %71, %70 : vector<16x8xf32>
    %73 = vector.extract_strided_slice %63 {offsets = [0, 8], sizes = [16, 8], strides = [1, 1]} : vector<16x32xf32> to vector<16x8xf32>
    %cst_48 = arith.constant 0.000000e+00 : f32
    %74 = vector.broadcast %cst_48 : f32 to vector<16x8xf32>
    %75 = arith.subf %74, %73 : vector<16x8xf32>
    %76 = math.exp %75 : vector<16x8xf32>
    %cst_49 = arith.constant 1.000000e+00 : f32
    %77 = vector.broadcast %cst_49 : f32 to vector<16x8xf32>
    %78 = arith.addf %77, %76 : vector<16x8xf32>
    %cst_50 = arith.constant 1.000000e+00 : f32
    %79 = vector.broadcast %cst_50 : f32 to vector<16x8xf32>
    %80 = arith.divf %79, %78 : vector<16x8xf32>
    %81 = vector.extract_strided_slice %63 {offsets = [0, 16], sizes = [16, 8], strides = [1, 1]} : vector<16x32xf32> to vector<16x8xf32>
    %cst_51 = arith.constant 0.000000e+00 : f32
    %82 = vector.broadcast %cst_51 : f32 to vector<16x8xf32>
    %83 = arith.subf %82, %81 : vector<16x8xf32>
    %84 = math.exp %83 : vector<16x8xf32>
    %cst_52 = arith.constant 1.000000e+00 : f32
    %85 = vector.broadcast %cst_52 : f32 to vector<16x8xf32>
    %86 = arith.addf %85, %84 : vector<16x8xf32>
    %cst_53 = arith.constant 1.000000e+00 : f32
    %87 = vector.broadcast %cst_53 : f32 to vector<16x8xf32>
    %88 = arith.divf %87, %86 : vector<16x8xf32>
    %89 = vector.extract_strided_slice %63 {offsets = [0, 24], sizes = [16, 8], strides = [1, 1]} : vector<16x32xf32> to vector<16x8xf32>
    %90 = math.tanh %89 : vector<16x8xf32>
    %91 = arith.mulf %80, %64 : vector<16x8xf32>
    %92 = arith.mulf %72, %90 : vector<16x8xf32>
    %93 = arith.addf %91, %92 : vector<16x8xf32>
    %94 = math.tanh %93 : vector<16x8xf32>
    %95 = arith.mulf %88, %94 : vector<16x8xf32>
    %c0_54 = arith.constant 0 : index
    %c0_55 = arith.constant 0 : index
    %96 = vector.load %arg12[%c0_54, %c0_55] : memref<16x8xf32, #tpu.memory_space<vmem>>, vector<16x8xf32>
    tpu.vector_store %arg12[%c0_54, %c0_55], %95 {strides = array<i32>} : memref<16x8xf32, #tpu.memory_space<vmem>>, vector<16x8xf32>,
    %c0_56 = arith.constant 0 : index
    %c0_57 = arith.constant 0 : index
    %97 = vector.load %arg13[%c0_56, %c0_57] : memref<16x8xf32, #tpu.memory_space<vmem>>, vector<16x8xf32>
    tpu.vector_store %arg13[%c0_56, %c0_57], %93 {strides = array<i32>} : memref<16x8xf32, #tpu.memory_space<vmem>>, vector<16x8xf32>,
    %c2_i32 = arith.constant 2 : i32
    %98 = arith.index_cast %c2_i32 : i32 to index
    %c0_58 = arith.constant 0 : index
    %c0_59 = arith.constant 0 : index
    %99 = vector.load %arg0[%98, %c0_58, %c0_59] : memref<6x16x4xf32, #tpu.memory_space<vmem>>, vector<1x16x4xf32>
    %100 = vector.shape_cast %99 : vector<1x16x4xf32> to vector<16x4xf32>
    %cst_60 = arith.constant dense<0.000000e+00> : vector<16x4xf32>
    %101 = tpu.matmul %0, %100, %cst_60 {dimension_numbers = #tpu.dot_dimension_numbers<[1], [0], [0], [1], [0, 0, 1, 1], [], []>} : vector<16x16xf32>, vector<16x4xf32>, vector<16x4xf32> -> vector<16x4xf32>
    %c0_61 = arith.constant 0 : index
    %c0_62 = arith.constant 0 : index
    %102 = vector.load %arg12[%c0_61, %c0_62] : memref<16x8xf32, #tpu.memory_space<vmem>>, vector<16x8xf32>
    %cst_63 = arith.constant dense<0.000000e+00> : vector<16x8xf32>
    %103 = tpu.matmul %0, %102, %cst_63 {dimension_numbers = #tpu.dot_dimension_numbers<[1], [0], [0], [1], [0, 0, 1, 1], [], []>} : vector<16x16xf32>, vector<16x8xf32>, vector<16x8xf32> -> vector<16x8xf32>
    %cst_64 = arith.constant dense<0.000000e+00> : vector<16x32xf32>
    %104 = tpu.matmul %101, %1, %cst_64 {dimension_numbers = #tpu.dot_dimension_numbers<[1], [0], [0], [1], [0, 0, 1, 1], [], []>} : vector<16x4xf32>, vector<4x32xf32>, vector<16x32xf32> -> vector<16x32xf32>
    %cst_65 = arith.constant dense<0.000000e+00> : vector<16x32xf32>
    %105 = tpu.matmul %103, %2, %cst_65 {dimension_numbers = #tpu.dot_dimension_numbers<[1], [0], [0], [1], [0, 0, 1, 1], [], []>} : vector<16x8xf32>, vector<8x32xf32>, vector<16x32xf32> -> vector<16x32xf32>
    %106 = arith.addf %104, %105 : vector<16x32xf32>
    %107 = vector.broadcast %3 : vector<1x32xf32> to vector<16x32xf32>
    %108 = arith.addf %106, %107 : vector<16x32xf32>
    %c0_66 = arith.constant 0 : index
    %c0_67 = arith.constant 0 : index
    %109 = vector.load %arg13[%c0_66, %c0_67] : memref<16x8xf32, #tpu.memory_space<vmem>>, vector<16x8xf32>
    %110 = vector.extract_strided_slice %108 {offsets = [0, 0], sizes = [16, 8], strides = [1, 1]} : vector<16x32xf32> to vector<16x8xf32>
    %cst_68 = arith.constant 0.000000e+00 : f32
    %111 = vector.broadcast %cst_68 : f32 to vector<16x8xf32>
    %112 = arith.subf %111, %110 : vector<16x8xf32>
    %113 = math.exp %112 : vector<16x8xf32>
    %cst_69 = arith.constant 1.000000e+00 : f32
    %114 = vector.broadcast %cst_69 : f32 to vector<16x8xf32>
    %115 = arith.addf %114, %113 : vector<16x8xf32>
    %cst_70 = arith.constant 1.000000e+00 : f32
    %116 = vector.broadcast %cst_70 : f32 to vector<16x8xf32>
    %117 = arith.divf %116, %115 : vector<16x8xf32>
    %118 = vector.extract_strided_slice %108 {offsets = [0, 8], sizes = [16, 8], strides = [1, 1]} : vector<16x32xf32> to vector<16x8xf32>
    %cst_71 = arith.constant 0.000000e+00 : f32
    %119 = vector.broadcast %cst_71 : f32 to vector<16x8xf32>
    %120 = arith.subf %119, %118 : vector<16x8xf32>
    %121 = math.exp %120 : vector<16x8xf32>
    %cst_72 = arith.constant 1.000000e+00 : f32
    %122 = vector.broadcast %cst_72 : f32 to vector<16x8xf32>
    %123 = arith.addf %122, %121 : vector<16x8xf32>
    %cst_73 = arith.constant 1.000000e+00 : f32
    %124 = vector.broadcast %cst_73 : f32 to vector<16x8xf32>
    %125 = arith.divf %124, %123 : vector<16x8xf32>
    %126 = vector.extract_strided_slice %108 {offsets = [0, 16], sizes = [16, 8], strides = [1, 1]} : vector<16x32xf32> to vector<16x8xf32>
    %cst_74 = arith.constant 0.000000e+00 : f32
    %127 = vector.broadcast %cst_74 : f32 to vector<16x8xf32>
    %128 = arith.subf %127, %126 : vector<16x8xf32>
    %129 = math.exp %128 : vector<16x8xf32>
    %cst_75 = arith.constant 1.000000e+00 : f32
    %130 = vector.broadcast %cst_75 : f32 to vector<16x8xf32>
    %131 = arith.addf %130, %129 : vector<16x8xf32>
    %cst_76 = arith.constant 1.000000e+00 : f32
    %132 = vector.broadcast %cst_76 : f32 to vector<16x8xf32>
    %133 = arith.divf %132, %131 : vector<16x8xf32>
    %134 = vector.extract_strided_slice %108 {offsets = [0, 24], sizes = [16, 8], strides = [1, 1]} : vector<16x32xf32> to vector<16x8xf32>
    %135 = math.tanh %134 : vector<16x8xf32>
    %136 = arith.mulf %125, %109 : vector<16x8xf32>
    %137 = arith.mulf %117, %135 : vector<16x8xf32>
    %138 = arith.addf %136, %137 : vector<16x8xf32>
    %139 = math.tanh %138 : vector<16x8xf32>
    %140 = arith.mulf %133, %139 : vector<16x8xf32>
    %c0_77 = arith.constant 0 : index
    %c0_78 = arith.constant 0 : index
    %141 = vector.load %arg12[%c0_77, %c0_78] : memref<16x8xf32, #tpu.memory_space<vmem>>, vector<16x8xf32>
    tpu.vector_store %arg12[%c0_77, %c0_78], %140 {strides = array<i32>} : memref<16x8xf32, #tpu.memory_space<vmem>>, vector<16x8xf32>,
    %c0_79 = arith.constant 0 : index
    %c0_80 = arith.constant 0 : index
    %142 = vector.load %arg13[%c0_79, %c0_80] : memref<16x8xf32, #tpu.memory_space<vmem>>, vector<16x8xf32>
    tpu.vector_store %arg13[%c0_79, %c0_80], %138 {strides = array<i32>} : memref<16x8xf32, #tpu.memory_space<vmem>>, vector<16x8xf32>,
    %c3_i32 = arith.constant 3 : i32
    %143 = arith.index_cast %c3_i32 : i32 to index
    %c0_81 = arith.constant 0 : index
    %c0_82 = arith.constant 0 : index
    %144 = vector.load %arg0[%143, %c0_81, %c0_82] : memref<6x16x4xf32, #tpu.memory_space<vmem>>, vector<1x16x4xf32>
    %145 = vector.shape_cast %144 : vector<1x16x4xf32> to vector<16x4xf32>
    %cst_83 = arith.constant dense<0.000000e+00> : vector<16x4xf32>
    %146 = tpu.matmul %0, %145, %cst_83 {dimension_numbers = #tpu.dot_dimension_numbers<[1], [0], [0], [1], [0, 0, 1, 1], [], []>} : vector<16x16xf32>, vector<16x4xf32>, vector<16x4xf32> -> vector<16x4xf32>
    %c0_84 = arith.constant 0 : index
    %c0_85 = arith.constant 0 : index
    %147 = vector.load %arg12[%c0_84, %c0_85] : memref<16x8xf32, #tpu.memory_space<vmem>>, vector<16x8xf32>
    %cst_86 = arith.constant dense<0.000000e+00> : vector<16x8xf32>
    %148 = tpu.matmul %0, %147, %cst_86 {dimension_numbers = #tpu.dot_dimension_numbers<[1], [0], [0], [1], [0, 0, 1, 1], [], []>} : vector<16x16xf32>, vector<16x8xf32>, vector<16x8xf32> -> vector<16x8xf32>
    %cst_87 = arith.constant dense<0.000000e+00> : vector<16x32xf32>
    %149 = tpu.matmul %146, %1, %cst_87 {dimension_numbers = #tpu.dot_dimension_numbers<[1], [0], [0], [1], [0, 0, 1, 1], [], []>} : vector<16x4xf32>, vector<4x32xf32>, vector<16x32xf32> -> vector<16x32xf32>
    %cst_88 = arith.constant dense<0.000000e+00> : vector<16x32xf32>
    %150 = tpu.matmul %148, %2, %cst_88 {dimension_numbers = #tpu.dot_dimension_numbers<[1], [0], [0], [1], [0, 0, 1, 1], [], []>} : vector<16x8xf32>, vector<8x32xf32>, vector<16x32xf32> -> vector<16x32xf32>
    %151 = arith.addf %149, %150 : vector<16x32xf32>
    %152 = vector.broadcast %3 : vector<1x32xf32> to vector<16x32xf32>
    %153 = arith.addf %151, %152 : vector<16x32xf32>
    %c0_89 = arith.constant 0 : index
    %c0_90 = arith.constant 0 : index
    %154 = vector.load %arg13[%c0_89, %c0_90] : memref<16x8xf32, #tpu.memory_space<vmem>>, vector<16x8xf32>
    %155 = vector.extract_strided_slice %153 {offsets = [0, 0], sizes = [16, 8], strides = [1, 1]} : vector<16x32xf32> to vector<16x8xf32>
    %cst_91 = arith.constant 0.000000e+00 : f32
    %156 = vector.broadcast %cst_91 : f32 to vector<16x8xf32>
    %157 = arith.subf %156, %155 : vector<16x8xf32>
    %158 = math.exp %157 : vector<16x8xf32>
    %cst_92 = arith.constant 1.000000e+00 : f32
    %159 = vector.broadcast %cst_92 : f32 to vector<16x8xf32>
    %160 = arith.addf %159, %158 : vector<16x8xf32>
    %cst_93 = arith.constant 1.000000e+00 : f32
    %161 = vector.broadcast %cst_93 : f32 to vector<16x8xf32>
    %162 = arith.divf %161, %160 : vector<16x8xf32>
    %163 = vector.extract_strided_slice %153 {offsets = [0, 8], sizes = [16, 8], strides = [1, 1]} : vector<16x32xf32> to vector<16x8xf32>
    %cst_94 = arith.constant 0.000000e+00 : f32
    %164 = vector.broadcast %cst_94 : f32 to vector<16x8xf32>
    %165 = arith.subf %164, %163 : vector<16x8xf32>
    %166 = math.exp %165 : vector<16x8xf32>
    %cst_95 = arith.constant 1.000000e+00 : f32
    %167 = vector.broadcast %cst_95 : f32 to vector<16x8xf32>
    %168 = arith.addf %167, %166 : vector<16x8xf32>
    %cst_96 = arith.constant 1.000000e+00 : f32
    %169 = vector.broadcast %cst_96 : f32 to vector<16x8xf32>
    %170 = arith.divf %169, %168 : vector<16x8xf32>
    %171 = vector.extract_strided_slice %153 {offsets = [0, 16], sizes = [16, 8], strides = [1, 1]} : vector<16x32xf32> to vector<16x8xf32>
    %cst_97 = arith.constant 0.000000e+00 : f32
    %172 = vector.broadcast %cst_97 : f32 to vector<16x8xf32>
    %173 = arith.subf %172, %171 : vector<16x8xf32>
    %174 = math.exp %173 : vector<16x8xf32>
    %cst_98 = arith.constant 1.000000e+00 : f32
    %175 = vector.broadcast %cst_98 : f32 to vector<16x8xf32>
    %176 = arith.addf %175, %174 : vector<16x8xf32>
    %cst_99 = arith.constant 1.000000e+00 : f32
    %177 = vector.broadcast %cst_99 : f32 to vector<16x8xf32>
    %178 = arith.divf %177, %176 : vector<16x8xf32>
    %179 = vector.extract_strided_slice %153 {offsets = [0, 24], sizes = [16, 8], strides = [1, 1]} : vector<16x32xf32> to vector<16x8xf32>
    %180 = math.tanh %179 : vector<16x8xf32>
    %181 = arith.mulf %170, %154 : vector<16x8xf32>
    %182 = arith.mulf %162, %180 : vector<16x8xf32>
    %183 = arith.addf %181, %182 : vector<16x8xf32>
    %184 = math.tanh %183 : vector<16x8xf32>
    %185 = arith.mulf %178, %184 : vector<16x8xf32>
    %c0_100 = arith.constant 0 : index
    %c0_101 = arith.constant 0 : index
    %186 = vector.load %arg12[%c0_100, %c0_101] : memref<16x8xf32, #tpu.memory_space<vmem>>, vector<16x8xf32>
    tpu.vector_store %arg12[%c0_100, %c0_101], %185 {strides = array<i32>} : memref<16x8xf32, #tpu.memory_space<vmem>>, vector<16x8xf32>,
    %c0_102 = arith.constant 0 : index
    %c0_103 = arith.constant 0 : index
    %187 = vector.load %arg13[%c0_102, %c0_103] : memref<16x8xf32, #tpu.memory_space<vmem>>, vector<16x8xf32>
    tpu.vector_store %arg13[%c0_102, %c0_103], %183 {strides = array<i32>} : memref<16x8xf32, #tpu.memory_space<vmem>>, vector<16x8xf32>,
    %c4_i32 = arith.constant 4 : i32
    %188 = arith.index_cast %c4_i32 : i32 to index
    %c0_104 = arith.constant 0 : index
    %c0_105 = arith.constant 0 : index
    %189 = vector.load %arg0[%188, %c0_104, %c0_105] : memref<6x16x4xf32, #tpu.memory_space<vmem>>, vector<1x16x4xf32>
    %190 = vector.shape_cast %189 : vector<1x16x4xf32> to vector<16x4xf32>
    %cst_106 = arith.constant dense<0.000000e+00> : vector<16x4xf32>
    %191 = tpu.matmul %0, %190, %cst_106 {dimension_numbers = #tpu.dot_dimension_numbers<[1], [0], [0], [1], [0, 0, 1, 1], [], []>} : vector<16x16xf32>, vector<16x4xf32>, vector<16x4xf32> -> vector<16x4xf32>
    %c0_107 = arith.constant 0 : index
    %c0_108 = arith.constant 0 : index
    %192 = vector.load %arg12[%c0_107, %c0_108] : memref<16x8xf32, #tpu.memory_space<vmem>>, vector<16x8xf32>
    %cst_109 = arith.constant dense<0.000000e+00> : vector<16x8xf32>
    %193 = tpu.matmul %0, %192, %cst_109 {dimension_numbers = #tpu.dot_dimension_numbers<[1], [0], [0], [1], [0, 0, 1, 1], [], []>} : vector<16x16xf32>, vector<16x8xf32>, vector<16x8xf32> -> vector<16x8xf32>
    %cst_110 = arith.constant dense<0.000000e+00> : vector<16x32xf32>
    %194 = tpu.matmul %191, %1, %cst_110 {dimension_numbers = #tpu.dot_dimension_numbers<[1], [0], [0], [1], [0, 0, 1, 1], [], []>} : vector<16x4xf32>, vector<4x32xf32>, vector<16x32xf32> -> vector<16x32xf32>
    %cst_111 = arith.constant dense<0.000000e+00> : vector<16x32xf32>
    %195 = tpu.matmul %193, %2, %cst_111 {dimension_numbers = #tpu.dot_dimension_numbers<[1], [0], [0], [1], [0, 0, 1, 1], [], []>} : vector<16x8xf32>, vector<8x32xf32>, vector<16x32xf32> -> vector<16x32xf32>
    %196 = arith.addf %194, %195 : vector<16x32xf32>
    %197 = vector.broadcast %3 : vector<1x32xf32> to vector<16x32xf32>
    %198 = arith.addf %196, %197 : vector<16x32xf32>
    %c0_112 = arith.constant 0 : index
    %c0_113 = arith.constant 0 : index
    %199 = vector.load %arg13[%c0_112, %c0_113] : memref<16x8xf32, #tpu.memory_space<vmem>>, vector<16x8xf32>
    %200 = vector.extract_strided_slice %198 {offsets = [0, 0], sizes = [16, 8], strides = [1, 1]} : vector<16x32xf32> to vector<16x8xf32>
    %cst_114 = arith.constant 0.000000e+00 : f32
    %201 = vector.broadcast %cst_114 : f32 to vector<16x8xf32>
    %202 = arith.subf %201, %200 : vector<16x8xf32>
    %203 = math.exp %202 : vector<16x8xf32>
    %cst_115 = arith.constant 1.000000e+00 : f32
    %204 = vector.broadcast %cst_115 : f32 to vector<16x8xf32>
    %205 = arith.addf %204, %203 : vector<16x8xf32>
    %cst_116 = arith.constant 1.000000e+00 : f32
    %206 = vector.broadcast %cst_116 : f32 to vector<16x8xf32>
    %207 = arith.divf %206, %205 : vector<16x8xf32>
    %208 = vector.extract_strided_slice %198 {offsets = [0, 8], sizes = [16, 8], strides = [1, 1]} : vector<16x32xf32> to vector<16x8xf32>
    %cst_117 = arith.constant 0.000000e+00 : f32
    %209 = vector.broadcast %cst_117 : f32 to vector<16x8xf32>
    %210 = arith.subf %209, %208 : vector<16x8xf32>
    %211 = math.exp %210 : vector<16x8xf32>
    %cst_118 = arith.constant 1.000000e+00 : f32
    %212 = vector.broadcast %cst_118 : f32 to vector<16x8xf32>
    %213 = arith.addf %212, %211 : vector<16x8xf32>
    %cst_119 = arith.constant 1.000000e+00 : f32
    %214 = vector.broadcast %cst_119 : f32 to vector<16x8xf32>
    %215 = arith.divf %214, %213 : vector<16x8xf32>
    %216 = vector.extract_strided_slice %198 {offsets = [0, 16], sizes = [16, 8], strides = [1, 1]} : vector<16x32xf32> to vector<16x8xf32>
    %cst_120 = arith.constant 0.000000e+00 : f32
    %217 = vector.broadcast %cst_120 : f32 to vector<16x8xf32>
    %218 = arith.subf %217, %216 : vector<16x8xf32>
    %219 = math.exp %218 : vector<16x8xf32>
    %cst_121 = arith.constant 1.000000e+00 : f32
    %220 = vector.broadcast %cst_121 : f32 to vector<16x8xf32>
    %221 = arith.addf %220, %219 : vector<16x8xf32>
    %cst_122 = arith.constant 1.000000e+00 : f32
    %222 = vector.broadcast %cst_122 : f32 to vector<16x8xf32>
    %223 = arith.divf %222, %221 : vector<16x8xf32>
    %224 = vector.extract_strided_slice %198 {offsets = [0, 24], sizes = [16, 8], strides = [1, 1]} : vector<16x32xf32> to vector<16x8xf32>
    %225 = math.tanh %224 : vector<16x8xf32>
    %226 = arith.mulf %215, %199 : vector<16x8xf32>
    %227 = arith.mulf %207, %225 : vector<16x8xf32>
    %228 = arith.addf %226, %227 : vector<16x8xf32>
    %229 = math.tanh %228 : vector<16x8xf32>
    %230 = arith.mulf %223, %229 : vector<16x8xf32>
    %c0_123 = arith.constant 0 : index
    %c0_124 = arith.constant 0 : index
    %231 = vector.load %arg12[%c0_123, %c0_124] : memref<16x8xf32, #tpu.memory_space<vmem>>, vector<16x8xf32>
    tpu.vector_store %arg12[%c0_123, %c0_124], %230 {strides = array<i32>} : memref<16x8xf32, #tpu.memory_space<vmem>>, vector<16x8xf32>,
    %c0_125 = arith.constant 0 : index
    %c0_126 = arith.constant 0 : index
    %232 = vector.load %arg13[%c0_125, %c0_126] : memref<16x8xf32, #tpu.memory_space<vmem>>, vector<16x8xf32>
    tpu.vector_store %arg13[%c0_125, %c0_126], %228 {strides = array<i32>} : memref<16x8xf32, #tpu.memory_space<vmem>>, vector<16x8xf32>,
    %c5_i32 = arith.constant 5 : i32
    %233 = arith.index_cast %c5_i32 : i32 to index
    %c0_127 = arith.constant 0 : index
    %c0_128 = arith.constant 0 : index
    %234 = vector.load %arg0[%233, %c0_127, %c0_128] : memref<6x16x4xf32, #tpu.memory_space<vmem>>, vector<1x16x4xf32>
    %235 = vector.shape_cast %234 : vector<1x16x4xf32> to vector<16x4xf32>
    %cst_129 = arith.constant dense<0.000000e+00> : vector<16x4xf32>
    %236 = tpu.matmul %0, %235, %cst_129 {dimension_numbers = #tpu.dot_dimension_numbers<[1], [0], [0], [1], [0, 0, 1, 1], [], []>} : vector<16x16xf32>, vector<16x4xf32>, vector<16x4xf32> -> vector<16x4xf32>
    %c0_130 = arith.constant 0 : index
    %c0_131 = arith.constant 0 : index
    %237 = vector.load %arg12[%c0_130, %c0_131] : memref<16x8xf32, #tpu.memory_space<vmem>>, vector<16x8xf32>
    %cst_132 = arith.constant dense<0.000000e+00> : vector<16x8xf32>
    %238 = tpu.matmul %0, %237, %cst_132 {dimension_numbers = #tpu.dot_dimension_numbers<[1], [0], [0], [1], [0, 0, 1, 1], [], []>} : vector<16x16xf32>, vector<16x8xf32>, vector<16x8xf32> -> vector<16x8xf32>
    %cst_133 = arith.constant dense<0.000000e+00> : vector<16x32xf32>
    %239 = tpu.matmul %236, %1, %cst_133 {dimension_numbers = #tpu.dot_dimension_numbers<[1], [0], [0], [1], [0, 0, 1, 1], [], []>} : vector<16x4xf32>, vector<4x32xf32>, vector<16x32xf32> -> vector<16x32xf32>
    %cst_134 = arith.constant dense<0.000000e+00> : vector<16x32xf32>
    %240 = tpu.matmul %238, %2, %cst_134 {dimension_numbers = #tpu.dot_dimension_numbers<[1], [0], [0], [1], [0, 0, 1, 1], [], []>} : vector<16x8xf32>, vector<8x32xf32>, vector<16x32xf32> -> vector<16x32xf32>
    %241 = arith.addf %239, %240 : vector<16x32xf32>
    %242 = vector.broadcast %3 : vector<1x32xf32> to vector<16x32xf32>
    %243 = arith.addf %241, %242 : vector<16x32xf32>
    %c0_135 = arith.constant 0 : index
    %c0_136 = arith.constant 0 : index
    %244 = vector.load %arg13[%c0_135, %c0_136] : memref<16x8xf32, #tpu.memory_space<vmem>>, vector<16x8xf32>
    %245 = vector.extract_strided_slice %243 {offsets = [0, 0], sizes = [16, 8], strides = [1, 1]} : vector<16x32xf32> to vector<16x8xf32>
    %cst_137 = arith.constant 0.000000e+00 : f32
    %246 = vector.broadcast %cst_137 : f32 to vector<16x8xf32>
    %247 = arith.subf %246, %245 : vector<16x8xf32>
    %248 = math.exp %247 : vector<16x8xf32>
    %cst_138 = arith.constant 1.000000e+00 : f32
    %249 = vector.broadcast %cst_138 : f32 to vector<16x8xf32>
    %250 = arith.addf %249, %248 : vector<16x8xf32>
    %cst_139 = arith.constant 1.000000e+00 : f32
    %251 = vector.broadcast %cst_139 : f32 to vector<16x8xf32>
    %252 = arith.divf %251, %250 : vector<16x8xf32>
    %253 = vector.extract_strided_slice %243 {offsets = [0, 8], sizes = [16, 8], strides = [1, 1]} : vector<16x32xf32> to vector<16x8xf32>
    %cst_140 = arith.constant 0.000000e+00 : f32
    %254 = vector.broadcast %cst_140 : f32 to vector<16x8xf32>
    %255 = arith.subf %254, %253 : vector<16x8xf32>
    %256 = math.exp %255 : vector<16x8xf32>
    %cst_141 = arith.constant 1.000000e+00 : f32
    %257 = vector.broadcast %cst_141 : f32 to vector<16x8xf32>
    %258 = arith.addf %257, %256 : vector<16x8xf32>
    %cst_142 = arith.constant 1.000000e+00 : f32
    %259 = vector.broadcast %cst_142 : f32 to vector<16x8xf32>
    %260 = arith.divf %259, %258 : vector<16x8xf32>
    %261 = vector.extract_strided_slice %243 {offsets = [0, 16], sizes = [16, 8], strides = [1, 1]} : vector<16x32xf32> to vector<16x8xf32>
    %cst_143 = arith.constant 0.000000e+00 : f32
    %262 = vector.broadcast %cst_143 : f32 to vector<16x8xf32>
    %263 = arith.subf %262, %261 : vector<16x8xf32>
    %264 = math.exp %263 : vector<16x8xf32>
    %cst_144 = arith.constant 1.000000e+00 : f32
    %265 = vector.broadcast %cst_144 : f32 to vector<16x8xf32>
    %266 = arith.addf %265, %264 : vector<16x8xf32>
    %cst_145 = arith.constant 1.000000e+00 : f32
    %267 = vector.broadcast %cst_145 : f32 to vector<16x8xf32>
    %268 = arith.divf %267, %266 : vector<16x8xf32>
    %269 = vector.extract_strided_slice %243 {offsets = [0, 24], sizes = [16, 8], strides = [1, 1]} : vector<16x32xf32> to vector<16x8xf32>
    %270 = math.tanh %269 : vector<16x8xf32>
    %271 = arith.mulf %260, %244 : vector<16x8xf32>
    %272 = arith.mulf %252, %270 : vector<16x8xf32>
    %273 = arith.addf %271, %272 : vector<16x8xf32>
    %274 = math.tanh %273 : vector<16x8xf32>
    %275 = arith.mulf %268, %274 : vector<16x8xf32>
    %c0_146 = arith.constant 0 : index
    %c0_147 = arith.constant 0 : index
    %276 = vector.load %arg12[%c0_146, %c0_147] : memref<16x8xf32, #tpu.memory_space<vmem>>, vector<16x8xf32>
    tpu.vector_store %arg12[%c0_146, %c0_147], %275 {strides = array<i32>} : memref<16x8xf32, #tpu.memory_space<vmem>>, vector<16x8xf32>,
    %c0_148 = arith.constant 0 : index
    %c0_149 = arith.constant 0 : index
    %277 = vector.load %arg13[%c0_148, %c0_149] : memref<16x8xf32, #tpu.memory_space<vmem>>, vector<16x8xf32>
    tpu.vector_store %arg13[%c0_148, %c0_149], %273 {strides = array<i32>} : memref<16x8xf32, #tpu.memory_space<vmem>>, vector<16x8xf32>,
    %c6_i32 = arith.constant 6 : i32
    %c0_150 = arith.constant 0 : index
    %c0_151 = arith.constant 0 : index
    %278 = vector.load %arg12[%c0_150, %c0_151] : memref<16x8xf32, #tpu.memory_space<vmem>>, vector<16x8xf32>
    %cst_152 = arith.constant dense<0.000000e+00> : vector<16x8xf32>
    %279 = tpu.matmul %0, %278, %cst_152 {dimension_numbers = #tpu.dot_dimension_numbers<[1], [0], [0], [1], [0, 0, 1, 1], [], []>} : vector<16x16xf32>, vector<16x8xf32>, vector<16x8xf32> -> vector<16x8xf32>
    %c0_153 = arith.constant 0 : index
    %c0_154 = arith.constant 0 : index
    %280 = vector.load %arg13[%c0_153, %c0_154] : memref<16x8xf32, #tpu.memory_space<vmem>>, vector<16x8xf32>
    %cst_155 = arith.constant dense<0.000000e+00> : vector<16x8xf32>
    %281 = tpu.matmul %0, %280, %cst_155 {dimension_numbers = #tpu.dot_dimension_numbers<[1], [0], [0], [1], [0, 0, 1, 1], [], []>} : vector<16x16xf32>, vector<16x8xf32>, vector<16x8xf32> -> vector<16x8xf32>
    %c0_156 = arith.constant 0 : index
    %c0_157 = arith.constant 0 : index
    %282 = vector.load %arg5[%c0_156, %c0_157] : memref<8x16xf32, #tpu.memory_space<vmem>>, vector<8x16xf32>
    %cst_158 = arith.constant dense<0.000000e+00> : vector<16x16xf32>
    %283 = tpu.matmul %279, %282, %cst_158 {dimension_numbers = #tpu.dot_dimension_numbers<[1], [0], [0], [1], [0, 0, 1, 1], [], []>} : vector<16x8xf32>, vector<8x16xf32>, vector<16x16xf32> -> vector<16x16xf32>
    %c0_159 = arith.constant 0 : index
    %c0_160 = arith.constant 0 : index
    %284 = vector.load %arg6[%c0_159, %c0_160] : memref<8x16xf32, #tpu.memory_space<vmem>>, vector<8x16xf32>
    %cst_161 = arith.constant dense<0.000000e+00> : vector<16x16xf32>
    %285 = tpu.matmul %281, %284, %cst_161 {dimension_numbers = #tpu.dot_dimension_numbers<[1], [0], [0], [1], [0, 0, 1, 1], [], []>} : vector<16x8xf32>, vector<8x16xf32>, vector<16x16xf32> -> vector<16x16xf32>
    %286 = arith.addf %283, %285 : vector<16x16xf32>
    %c0_162 = arith.constant 0 : index
    %c0_163 = arith.constant 0 : index
    %287 = vector.load %arg7[%c0_162, %c0_163] : memref<1x16xf32, #tpu.memory_space<vmem>>, vector<1x16xf32>
    %288 = vector.broadcast %287 : vector<1x16xf32> to vector<16x16xf32>
    %289 = arith.addf %286, %288 : vector<16x16xf32>
    %cst_164 = arith.constant 0.000000e+00 : f32
    %290 = vector.broadcast %cst_164 : f32 to vector<16x16xf32>
    %291 = arith.cmpf ogt, %289, %290 : vector<16x16xf32>
    %cst_165 = arith.constant 0.000000e+00 : f32
    %292 = vector.broadcast %cst_165 : f32 to vector<16x16xf32>
    %293 = arith.minimumf %289, %292 : vector<16x16xf32>
    %294 = math.exp %293 : vector<16x16xf32>
    %cst_166 = arith.constant 1.000000e+00 : f32
    %295 = vector.broadcast %cst_166 : f32 to vector<16x16xf32>
    %296 = arith.subf %294, %295 : vector<16x16xf32>
    %297 = arith.select %291, %289, %296 : vector<16x16xi1>, vector<16x16xf32>
    %298 = vector.extract_strided_slice %297 {offsets = [0, 0], sizes = [16, 8], strides = [1, 1]} : vector<16x16xf32> to vector<16x8xf32>
    %c0_167 = arith.constant 0 : index
    %c0_168 = arith.constant 0 : index
    %299 = vector.load %arg14[%c0_167, %c0_168] : memref<16x8xf32, #tpu.memory_space<vmem>>, vector<16x8xf32>
    tpu.vector_store %arg14[%c0_167, %c0_168], %298 {strides = array<i32>} : memref<16x8xf32, #tpu.memory_space<vmem>>, vector<16x8xf32>,
    %300 = vector.extract_strided_slice %297 {offsets = [0, 8], sizes = [16, 8], strides = [1, 1]} : vector<16x16xf32> to vector<16x8xf32>
    %c0_169 = arith.constant 0 : index
    %c0_170 = arith.constant 0 : index
    %301 = vector.load %arg15[%c0_169, %c0_170] : memref<16x8xf32, #tpu.memory_space<vmem>>, vector<16x8xf32>
    tpu.vector_store %arg15[%c0_169, %c0_170], %300 {strides = array<i32>} : memref<16x8xf32, #tpu.memory_space<vmem>>, vector<16x8xf32>,
    %c0_171 = arith.constant 0 : index
    %c0_172 = arith.constant 0 : index
    %302 = vector.load %arg8[%c0_171, %c0_172] : memref<8x32xf32, #tpu.memory_space<vmem>>, vector<8x32xf32>
    %cst_173 = arith.constant dense<0.000000e+00> : vector<16x32xf32>
    %303 = tpu.matmul %279, %302, %cst_173 {dimension_numbers = #tpu.dot_dimension_numbers<[1], [0], [0], [1], [0, 0, 1, 1], [], []>} : vector<16x8xf32>, vector<8x32xf32>, vector<16x32xf32> -> vector<16x32xf32>
    %c0_174 = arith.constant 0 : index
    %c0_175 = arith.constant 0 : index
    %304 = vector.load %arg10[%c0_174, %c0_175] : memref<1x32xf32, #tpu.memory_space<vmem>>, vector<1x32xf32>
    %305 = vector.broadcast %304 : vector<1x32xf32> to vector<16x32xf32>
    %306 = arith.addf %303, %305 : vector<16x32xf32>
    %c0_176 = arith.constant 0 : index
    %c0_177 = arith.constant 0 : index
    %307 = vector.load %arg9[%c0_176, %c0_177] : memref<8x32xf32, #tpu.memory_space<vmem>>, vector<8x32xf32>
    %c0_i32_178 = arith.constant 0 : i32
    %c0_179 = arith.constant 0 : index
    %c0_180 = arith.constant 0 : index
    %308 = vector.load %arg14[%c0_179, %c0_180] : memref<16x8xf32, #tpu.memory_space<vmem>>, vector<16x8xf32>
    %cst_181 = arith.constant dense<0.000000e+00> : vector<16x8xf32>
    %309 = tpu.matmul %0, %308, %cst_181 {dimension_numbers = #tpu.dot_dimension_numbers<[1], [0], [0], [1], [0, 0, 1, 1], [], []>} : vector<16x16xf32>, vector<16x8xf32>, vector<16x8xf32> -> vector<16x8xf32>
    %cst_182 = arith.constant dense<0.000000e+00> : vector<16x32xf32>
    %310 = tpu.matmul %309, %307, %cst_182 {dimension_numbers = #tpu.dot_dimension_numbers<[1], [0], [0], [1], [0, 0, 1, 1], [], []>} : vector<16x8xf32>, vector<8x32xf32>, vector<16x32xf32> -> vector<16x32xf32>
    %311 = arith.addf %310, %306 : vector<16x32xf32>
    %c0_183 = arith.constant 0 : index
    %c0_184 = arith.constant 0 : index
    %312 = vector.load %arg15[%c0_183, %c0_184] : memref<16x8xf32, #tpu.memory_space<vmem>>, vector<16x8xf32>
    %313 = vector.extract_strided_slice %311 {offsets = [0, 0], sizes = [16, 8], strides = [1, 1]} : vector<16x32xf32> to vector<16x8xf32>
    %cst_185 = arith.constant 0.000000e+00 : f32
    %314 = vector.broadcast %cst_185 : f32 to vector<16x8xf32>
    %315 = arith.subf %314, %313 : vector<16x8xf32>
    %316 = math.exp %315 : vector<16x8xf32>
    %cst_186 = arith.constant 1.000000e+00 : f32
    %317 = vector.broadcast %cst_186 : f32 to vector<16x8xf32>
    %318 = arith.addf %317, %316 : vector<16x8xf32>
    %cst_187 = arith.constant 1.000000e+00 : f32
    %319 = vector.broadcast %cst_187 : f32 to vector<16x8xf32>
    %320 = arith.divf %319, %318 : vector<16x8xf32>
    %321 = vector.extract_strided_slice %311 {offsets = [0, 8], sizes = [16, 8], strides = [1, 1]} : vector<16x32xf32> to vector<16x8xf32>
    %cst_188 = arith.constant 0.000000e+00 : f32
    %322 = vector.broadcast %cst_188 : f32 to vector<16x8xf32>
    %323 = arith.subf %322, %321 : vector<16x8xf32>
    %324 = math.exp %323 : vector<16x8xf32>
    %cst_189 = arith.constant 1.000000e+00 : f32
    %325 = vector.broadcast %cst_189 : f32 to vector<16x8xf32>
    %326 = arith.addf %325, %324 : vector<16x8xf32>
    %cst_190 = arith.constant 1.000000e+00 : f32
    %327 = vector.broadcast %cst_190 : f32 to vector<16x8xf32>
    %328 = arith.divf %327, %326 : vector<16x8xf32>
    %329 = vector.extract_strided_slice %311 {offsets = [0, 16], sizes = [16, 8], strides = [1, 1]} : vector<16x32xf32> to vector<16x8xf32>
    %cst_191 = arith.constant 0.000000e+00 : f32
    %330 = vector.broadcast %cst_191 : f32 to vector<16x8xf32>
    %331 = arith.subf %330, %329 : vector<16x8xf32>
    %332 = math.exp %331 : vector<16x8xf32>
    %cst_192 = arith.constant 1.000000e+00 : f32
    %333 = vector.broadcast %cst_192 : f32 to vector<16x8xf32>
    %334 = arith.addf %333, %332 : vector<16x8xf32>
    %cst_193 = arith.constant 1.000000e+00 : f32
    %335 = vector.broadcast %cst_193 : f32 to vector<16x8xf32>
    %336 = arith.divf %335, %334 : vector<16x8xf32>
    %337 = vector.extract_strided_slice %311 {offsets = [0, 24], sizes = [16, 8], strides = [1, 1]} : vector<16x32xf32> to vector<16x8xf32>
    %338 = math.tanh %337 : vector<16x8xf32>
    %339 = arith.mulf %328, %312 : vector<16x8xf32>
    %340 = arith.mulf %320, %338 : vector<16x8xf32>
    %341 = arith.addf %339, %340 : vector<16x8xf32>
    %342 = math.tanh %341 : vector<16x8xf32>
    %343 = arith.mulf %336, %342 : vector<16x8xf32>
    %c0_194 = arith.constant 0 : index
    %c0_195 = arith.constant 0 : index
    %344 = vector.load %arg14[%c0_194, %c0_195] : memref<16x8xf32, #tpu.memory_space<vmem>>, vector<16x8xf32>
    tpu.vector_store %arg14[%c0_194, %c0_195], %343 {strides = array<i32>} : memref<16x8xf32, #tpu.memory_space<vmem>>, vector<16x8xf32>,
    %c0_196 = arith.constant 0 : index
    %c0_197 = arith.constant 0 : index
    %345 = vector.load %arg15[%c0_196, %c0_197] : memref<16x8xf32, #tpu.memory_space<vmem>>, vector<16x8xf32>
    tpu.vector_store %arg15[%c0_196, %c0_197], %341 {strides = array<i32>} : memref<16x8xf32, #tpu.memory_space<vmem>>, vector<16x8xf32>,
    %346 = arith.index_cast %c0_i32_178 : i32 to index
    %c0_198 = arith.constant 0 : index
    %c0_199 = arith.constant 0 : index
    %347 = vector.load %arg11[%346, %c0_198, %c0_199] : memref<5x16x8xf32, #tpu.memory_space<vmem>>, vector<1x16x8xf32>
    %348 = vector.shape_cast %347 : vector<1x16x8xf32> to vector<16x8xf32>
    %349 = vector.shape_cast %343 : vector<16x8xf32> to vector<1x16x8xf32>
    tpu.vector_store %arg11[%346, %c0_198, %c0_199], %349 {strides = array<i32>} : memref<5x16x8xf32, #tpu.memory_space<vmem>>, vector<1x16x8xf32>,
    %c1_i32_200 = arith.constant 1 : i32
    %c0_201 = arith.constant 0 : index
    %c0_202 = arith.constant 0 : index
    %350 = vector.load %arg14[%c0_201, %c0_202] : memref<16x8xf32, #tpu.memory_space<vmem>>, vector<16x8xf32>
    %cst_203 = arith.constant dense<0.000000e+00> : vector<16x8xf32>
    %351 = tpu.matmul %0, %350, %cst_203 {dimension_numbers = #tpu.dot_dimension_numbers<[1], [0], [0], [1], [0, 0, 1, 1], [], []>} : vector<16x16xf32>, vector<16x8xf32>, vector<16x8xf32> -> vector<16x8xf32>
    %cst_204 = arith.constant dense<0.000000e+00> : vector<16x32xf32>
    %352 = tpu.matmul %351, %307, %cst_204 {dimension_numbers = #tpu.dot_dimension_numbers<[1], [0], [0], [1], [0, 0, 1, 1], [], []>} : vector<16x8xf32>, vector<8x32xf32>, vector<16x32xf32> -> vector<16x32xf32>
    %353 = arith.addf %352, %306 : vector<16x32xf32>
    %c0_205 = arith.constant 0 : index
    %c0_206 = arith.constant 0 : index
    %354 = vector.load %arg15[%c0_205, %c0_206] : memref<16x8xf32, #tpu.memory_space<vmem>>, vector<16x8xf32>
    %355 = vector.extract_strided_slice %353 {offsets = [0, 0], sizes = [16, 8], strides = [1, 1]} : vector<16x32xf32> to vector<16x8xf32>
    %cst_207 = arith.constant 0.000000e+00 : f32
    %356 = vector.broadcast %cst_207 : f32 to vector<16x8xf32>
    %357 = arith.subf %356, %355 : vector<16x8xf32>
    %358 = math.exp %357 : vector<16x8xf32>
    %cst_208 = arith.constant 1.000000e+00 : f32
    %359 = vector.broadcast %cst_208 : f32 to vector<16x8xf32>
    %360 = arith.addf %359, %358 : vector<16x8xf32>
    %cst_209 = arith.constant 1.000000e+00 : f32
    %361 = vector.broadcast %cst_209 : f32 to vector<16x8xf32>
    %362 = arith.divf %361, %360 : vector<16x8xf32>
    %363 = vector.extract_strided_slice %353 {offsets = [0, 8], sizes = [16, 8], strides = [1, 1]} : vector<16x32xf32> to vector<16x8xf32>
    %cst_210 = arith.constant 0.000000e+00 : f32
    %364 = vector.broadcast %cst_210 : f32 to vector<16x8xf32>
    %365 = arith.subf %364, %363 : vector<16x8xf32>
    %366 = math.exp %365 : vector<16x8xf32>
    %cst_211 = arith.constant 1.000000e+00 : f32
    %367 = vector.broadcast %cst_211 : f32 to vector<16x8xf32>
    %368 = arith.addf %367, %366 : vector<16x8xf32>
    %cst_212 = arith.constant 1.000000e+00 : f32
    %369 = vector.broadcast %cst_212 : f32 to vector<16x8xf32>
    %370 = arith.divf %369, %368 : vector<16x8xf32>
    %371 = vector.extract_strided_slice %353 {offsets = [0, 16], sizes = [16, 8], strides = [1, 1]} : vector<16x32xf32> to vector<16x8xf32>
    %cst_213 = arith.constant 0.000000e+00 : f32
    %372 = vector.broadcast %cst_213 : f32 to vector<16x8xf32>
    %373 = arith.subf %372, %371 : vector<16x8xf32>
    %374 = math.exp %373 : vector<16x8xf32>
    %cst_214 = arith.constant 1.000000e+00 : f32
    %375 = vector.broadcast %cst_214 : f32 to vector<16x8xf32>
    %376 = arith.addf %375, %374 : vector<16x8xf32>
    %cst_215 = arith.constant 1.000000e+00 : f32
    %377 = vector.broadcast %cst_215 : f32 to vector<16x8xf32>
    %378 = arith.divf %377, %376 : vector<16x8xf32>
    %379 = vector.extract_strided_slice %353 {offsets = [0, 24], sizes = [16, 8], strides = [1, 1]} : vector<16x32xf32> to vector<16x8xf32>
    %380 = math.tanh %379 : vector<16x8xf32>
    %381 = arith.mulf %370, %354 : vector<16x8xf32>
    %382 = arith.mulf %362, %380 : vector<16x8xf32>
    %383 = arith.addf %381, %382 : vector<16x8xf32>
    %384 = math.tanh %383 : vector<16x8xf32>
    %385 = arith.mulf %378, %384 : vector<16x8xf32>
    %c0_216 = arith.constant 0 : index
    %c0_217 = arith.constant 0 : index
    %386 = vector.load %arg14[%c0_216, %c0_217] : memref<16x8xf32, #tpu.memory_space<vmem>>, vector<16x8xf32>
    tpu.vector_store %arg14[%c0_216, %c0_217], %385 {strides = array<i32>} : memref<16x8xf32, #tpu.memory_space<vmem>>, vector<16x8xf32>,
    %c0_218 = arith.constant 0 : index
    %c0_219 = arith.constant 0 : index
    %387 = vector.load %arg15[%c0_218, %c0_219] : memref<16x8xf32, #tpu.memory_space<vmem>>, vector<16x8xf32>
    tpu.vector_store %arg15[%c0_218, %c0_219], %383 {strides = array<i32>} : memref<16x8xf32, #tpu.memory_space<vmem>>, vector<16x8xf32>,
    %388 = arith.index_cast %c1_i32_200 : i32 to index
    %c0_220 = arith.constant 0 : index
    %c0_221 = arith.constant 0 : index
    %389 = vector.load %arg11[%388, %c0_220, %c0_221] : memref<5x16x8xf32, #tpu.memory_space<vmem>>, vector<1x16x8xf32>
    %390 = vector.shape_cast %389 : vector<1x16x8xf32> to vector<16x8xf32>
    %391 = vector.shape_cast %385 : vector<16x8xf32> to vector<1x16x8xf32>
    tpu.vector_store %arg11[%388, %c0_220, %c0_221], %391 {strides = array<i32>} : memref<5x16x8xf32, #tpu.memory_space<vmem>>, vector<1x16x8xf32>,
    %c2_i32_222 = arith.constant 2 : i32
    %c0_223 = arith.constant 0 : index
    %c0_224 = arith.constant 0 : index
    %392 = vector.load %arg14[%c0_223, %c0_224] : memref<16x8xf32, #tpu.memory_space<vmem>>, vector<16x8xf32>
    %cst_225 = arith.constant dense<0.000000e+00> : vector<16x8xf32>
    %393 = tpu.matmul %0, %392, %cst_225 {dimension_numbers = #tpu.dot_dimension_numbers<[1], [0], [0], [1], [0, 0, 1, 1], [], []>} : vector<16x16xf32>, vector<16x8xf32>, vector<16x8xf32> -> vector<16x8xf32>
    %cst_226 = arith.constant dense<0.000000e+00> : vector<16x32xf32>
    %394 = tpu.matmul %393, %307, %cst_226 {dimension_numbers = #tpu.dot_dimension_numbers<[1], [0], [0], [1], [0, 0, 1, 1], [], []>} : vector<16x8xf32>, vector<8x32xf32>, vector<16x32xf32> -> vector<16x32xf32>
    %395 = arith.addf %394, %306 : vector<16x32xf32>
    %c0_227 = arith.constant 0 : index
    %c0_228 = arith.constant 0 : index
    %396 = vector.load %arg15[%c0_227, %c0_228] : memref<16x8xf32, #tpu.memory_space<vmem>>, vector<16x8xf32>
    %397 = vector.extract_strided_slice %395 {offsets = [0, 0], sizes = [16, 8], strides = [1, 1]} : vector<16x32xf32> to vector<16x8xf32>
    %cst_229 = arith.constant 0.000000e+00 : f32
    %398 = vector.broadcast %cst_229 : f32 to vector<16x8xf32>
    %399 = arith.subf %398, %397 : vector<16x8xf32>
    %400 = math.exp %399 : vector<16x8xf32>
    %cst_230 = arith.constant 1.000000e+00 : f32
    %401 = vector.broadcast %cst_230 : f32 to vector<16x8xf32>
    %402 = arith.addf %401, %400 : vector<16x8xf32>
    %cst_231 = arith.constant 1.000000e+00 : f32
    %403 = vector.broadcast %cst_231 : f32 to vector<16x8xf32>
    %404 = arith.divf %403, %402 : vector<16x8xf32>
    %405 = vector.extract_strided_slice %395 {offsets = [0, 8], sizes = [16, 8], strides = [1, 1]} : vector<16x32xf32> to vector<16x8xf32>
    %cst_232 = arith.constant 0.000000e+00 : f32
    %406 = vector.broadcast %cst_232 : f32 to vector<16x8xf32>
    %407 = arith.subf %406, %405 : vector<16x8xf32>
    %408 = math.exp %407 : vector<16x8xf32>
    %cst_233 = arith.constant 1.000000e+00 : f32
    %409 = vector.broadcast %cst_233 : f32 to vector<16x8xf32>
    %410 = arith.addf %409, %408 : vector<16x8xf32>
    %cst_234 = arith.constant 1.000000e+00 : f32
    %411 = vector.broadcast %cst_234 : f32 to vector<16x8xf32>
    %412 = arith.divf %411, %410 : vector<16x8xf32>
    %413 = vector.extract_strided_slice %395 {offsets = [0, 16], sizes = [16, 8], strides = [1, 1]} : vector<16x32xf32> to vector<16x8xf32>
    %cst_235 = arith.constant 0.000000e+00 : f32
    %414 = vector.broadcast %cst_235 : f32 to vector<16x8xf32>
    %415 = arith.subf %414, %413 : vector<16x8xf32>
    %416 = math.exp %415 : vector<16x8xf32>
    %cst_236 = arith.constant 1.000000e+00 : f32
    %417 = vector.broadcast %cst_236 : f32 to vector<16x8xf32>
    %418 = arith.addf %417, %416 : vector<16x8xf32>
    %cst_237 = arith.constant 1.000000e+00 : f32
    %419 = vector.broadcast %cst_237 : f32 to vector<16x8xf32>
    %420 = arith.divf %419, %418 : vector<16x8xf32>
    %421 = vector.extract_strided_slice %395 {offsets = [0, 24], sizes = [16, 8], strides = [1, 1]} : vector<16x32xf32> to vector<16x8xf32>
    %422 = math.tanh %421 : vector<16x8xf32>
    %423 = arith.mulf %412, %396 : vector<16x8xf32>
    %424 = arith.mulf %404, %422 : vector<16x8xf32>
    %425 = arith.addf %423, %424 : vector<16x8xf32>
    %426 = math.tanh %425 : vector<16x8xf32>
    %427 = arith.mulf %420, %426 : vector<16x8xf32>
    %c0_238 = arith.constant 0 : index
    %c0_239 = arith.constant 0 : index
    %428 = vector.load %arg14[%c0_238, %c0_239] : memref<16x8xf32, #tpu.memory_space<vmem>>, vector<16x8xf32>
    tpu.vector_store %arg14[%c0_238, %c0_239], %427 {strides = array<i32>} : memref<16x8xf32, #tpu.memory_space<vmem>>, vector<16x8xf32>,
    %c0_240 = arith.constant 0 : index
    %c0_241 = arith.constant 0 : index
    %429 = vector.load %arg15[%c0_240, %c0_241] : memref<16x8xf32, #tpu.memory_space<vmem>>, vector<16x8xf32>
    tpu.vector_store %arg15[%c0_240, %c0_241], %425 {strides = array<i32>} : memref<16x8xf32, #tpu.memory_space<vmem>>, vector<16x8xf32>,
    %430 = arith.index_cast %c2_i32_222 : i32 to index
    %c0_242 = arith.constant 0 : index
    %c0_243 = arith.constant 0 : index
    %431 = vector.load %arg11[%430, %c0_242, %c0_243] : memref<5x16x8xf32, #tpu.memory_space<vmem>>, vector<1x16x8xf32>
    %432 = vector.shape_cast %431 : vector<1x16x8xf32> to vector<16x8xf32>
    %433 = vector.shape_cast %427 : vector<16x8xf32> to vector<1x16x8xf32>
    tpu.vector_store %arg11[%430, %c0_242, %c0_243], %433 {strides = array<i32>} : memref<5x16x8xf32, #tpu.memory_space<vmem>>, vector<1x16x8xf32>,
    %c3_i32_244 = arith.constant 3 : i32
    %c0_245 = arith.constant 0 : index
    %c0_246 = arith.constant 0 : index
    %434 = vector.load %arg14[%c0_245, %c0_246] : memref<16x8xf32, #tpu.memory_space<vmem>>, vector<16x8xf32>
    %cst_247 = arith.constant dense<0.000000e+00> : vector<16x8xf32>
    %435 = tpu.matmul %0, %434, %cst_247 {dimension_numbers = #tpu.dot_dimension_numbers<[1], [0], [0], [1], [0, 0, 1, 1], [], []>} : vector<16x16xf32>, vector<16x8xf32>, vector<16x8xf32> -> vector<16x8xf32>
    %cst_248 = arith.constant dense<0.000000e+00> : vector<16x32xf32>
    %436 = tpu.matmul %435, %307, %cst_248 {dimension_numbers = #tpu.dot_dimension_numbers<[1], [0], [0], [1], [0, 0, 1, 1], [], []>} : vector<16x8xf32>, vector<8x32xf32>, vector<16x32xf32> -> vector<16x32xf32>
    %437 = arith.addf %436, %306 : vector<16x32xf32>
    %c0_249 = arith.constant 0 : index
    %c0_250 = arith.constant 0 : index
    %438 = vector.load %arg15[%c0_249, %c0_250] : memref<16x8xf32, #tpu.memory_space<vmem>>, vector<16x8xf32>
    %439 = vector.extract_strided_slice %437 {offsets = [0, 0], sizes = [16, 8], strides = [1, 1]} : vector<16x32xf32> to vector<16x8xf32>
    %cst_251 = arith.constant 0.000000e+00 : f32
    %440 = vector.broadcast %cst_251 : f32 to vector<16x8xf32>
    %441 = arith.subf %440, %439 : vector<16x8xf32>
    %442 = math.exp %441 : vector<16x8xf32>
    %cst_252 = arith.constant 1.000000e+00 : f32
    %443 = vector.broadcast %cst_252 : f32 to vector<16x8xf32>
    %444 = arith.addf %443, %442 : vector<16x8xf32>
    %cst_253 = arith.constant 1.000000e+00 : f32
    %445 = vector.broadcast %cst_253 : f32 to vector<16x8xf32>
    %446 = arith.divf %445, %444 : vector<16x8xf32>
    %447 = vector.extract_strided_slice %437 {offsets = [0, 8], sizes = [16, 8], strides = [1, 1]} : vector<16x32xf32> to vector<16x8xf32>
    %cst_254 = arith.constant 0.000000e+00 : f32
    %448 = vector.broadcast %cst_254 : f32 to vector<16x8xf32>
    %449 = arith.subf %448, %447 : vector<16x8xf32>
    %450 = math.exp %449 : vector<16x8xf32>
    %cst_255 = arith.constant 1.000000e+00 : f32
    %451 = vector.broadcast %cst_255 : f32 to vector<16x8xf32>
    %452 = arith.addf %451, %450 : vector<16x8xf32>
    %cst_256 = arith.constant 1.000000e+00 : f32
    %453 = vector.broadcast %cst_256 : f32 to vector<16x8xf32>
    %454 = arith.divf %453, %452 : vector<16x8xf32>
    %455 = vector.extract_strided_slice %437 {offsets = [0, 16], sizes = [16, 8], strides = [1, 1]} : vector<16x32xf32> to vector<16x8xf32>
    %cst_257 = arith.constant 0.000000e+00 : f32
    %456 = vector.broadcast %cst_257 : f32 to vector<16x8xf32>
    %457 = arith.subf %456, %455 : vector<16x8xf32>
    %458 = math.exp %457 : vector<16x8xf32>
    %cst_258 = arith.constant 1.000000e+00 : f32
    %459 = vector.broadcast %cst_258 : f32 to vector<16x8xf32>
    %460 = arith.addf %459, %458 : vector<16x8xf32>
    %cst_259 = arith.constant 1.000000e+00 : f32
    %461 = vector.broadcast %cst_259 : f32 to vector<16x8xf32>
    %462 = arith.divf %461, %460 : vector<16x8xf32>
    %463 = vector.extract_strided_slice %437 {offsets = [0, 24], sizes = [16, 8], strides = [1, 1]} : vector<16x32xf32> to vector<16x8xf32>
    %464 = math.tanh %463 : vector<16x8xf32>
    %465 = arith.mulf %454, %438 : vector<16x8xf32>
    %466 = arith.mulf %446, %464 : vector<16x8xf32>
    %467 = arith.addf %465, %466 : vector<16x8xf32>
    %468 = math.tanh %467 : vector<16x8xf32>
    %469 = arith.mulf %462, %468 : vector<16x8xf32>
    %c0_260 = arith.constant 0 : index
    %c0_261 = arith.constant 0 : index
    %470 = vector.load %arg14[%c0_260, %c0_261] : memref<16x8xf32, #tpu.memory_space<vmem>>, vector<16x8xf32>
    tpu.vector_store %arg14[%c0_260, %c0_261], %469 {strides = array<i32>} : memref<16x8xf32, #tpu.memory_space<vmem>>, vector<16x8xf32>,
    %c0_262 = arith.constant 0 : index
    %c0_263 = arith.constant 0 : index
    %471 = vector.load %arg15[%c0_262, %c0_263] : memref<16x8xf32, #tpu.memory_space<vmem>>, vector<16x8xf32>
    tpu.vector_store %arg15[%c0_262, %c0_263], %467 {strides = array<i32>} : memref<16x8xf32, #tpu.memory_space<vmem>>, vector<16x8xf32>,
    %472 = arith.index_cast %c3_i32_244 : i32 to index
    %c0_264 = arith.constant 0 : index
    %c0_265 = arith.constant 0 : index
    %473 = vector.load %arg11[%472, %c0_264, %c0_265] : memref<5x16x8xf32, #tpu.memory_space<vmem>>, vector<1x16x8xf32>
    %474 = vector.shape_cast %473 : vector<1x16x8xf32> to vector<16x8xf32>
    %475 = vector.shape_cast %469 : vector<16x8xf32> to vector<1x16x8xf32>
    tpu.vector_store %arg11[%472, %c0_264, %c0_265], %475 {strides = array<i32>} : memref<5x16x8xf32, #tpu.memory_space<vmem>>, vector<1x16x8xf32>,
    %c4_i32_266 = arith.constant 4 : i32
    %c0_267 = arith.constant 0 : index
    %c0_268 = arith.constant 0 : index
    %476 = vector.load %arg14[%c0_267, %c0_268] : memref<16x8xf32, #tpu.memory_space<vmem>>, vector<16x8xf32>
    %cst_269 = arith.constant dense<0.000000e+00> : vector<16x8xf32>
    %477 = tpu.matmul %0, %476, %cst_269 {dimension_numbers = #tpu.dot_dimension_numbers<[1], [0], [0], [1], [0, 0, 1, 1], [], []>} : vector<16x16xf32>, vector<16x8xf32>, vector<16x8xf32> -> vector<16x8xf32>
    %cst_270 = arith.constant dense<0.000000e+00> : vector<16x32xf32>
    %478 = tpu.matmul %477, %307, %cst_270 {dimension_numbers = #tpu.dot_dimension_numbers<[1], [0], [0], [1], [0, 0, 1, 1], [], []>} : vector<16x8xf32>, vector<8x32xf32>, vector<16x32xf32> -> vector<16x32xf32>
    %479 = arith.addf %478, %306 : vector<16x32xf32>
    %c0_271 = arith.constant 0 : index
    %c0_272 = arith.constant 0 : index
    %480 = vector.load %arg15[%c0_271, %c0_272] : memref<16x8xf32, #tpu.memory_space<vmem>>, vector<16x8xf32>
    %481 = vector.extract_strided_slice %479 {offsets = [0, 0], sizes = [16, 8], strides = [1, 1]} : vector<16x32xf32> to vector<16x8xf32>
    %cst_273 = arith.constant 0.000000e+00 : f32
    %482 = vector.broadcast %cst_273 : f32 to vector<16x8xf32>
    %483 = arith.subf %482, %481 : vector<16x8xf32>
    %484 = math.exp %483 : vector<16x8xf32>
    %cst_274 = arith.constant 1.000000e+00 : f32
    %485 = vector.broadcast %cst_274 : f32 to vector<16x8xf32>
    %486 = arith.addf %485, %484 : vector<16x8xf32>
    %cst_275 = arith.constant 1.000000e+00 : f32
    %487 = vector.broadcast %cst_275 : f32 to vector<16x8xf32>
    %488 = arith.divf %487, %486 : vector<16x8xf32>
    %489 = vector.extract_strided_slice %479 {offsets = [0, 8], sizes = [16, 8], strides = [1, 1]} : vector<16x32xf32> to vector<16x8xf32>
    %cst_276 = arith.constant 0.000000e+00 : f32
    %490 = vector.broadcast %cst_276 : f32 to vector<16x8xf32>
    %491 = arith.subf %490, %489 : vector<16x8xf32>
    %492 = math.exp %491 : vector<16x8xf32>
    %cst_277 = arith.constant 1.000000e+00 : f32
    %493 = vector.broadcast %cst_277 : f32 to vector<16x8xf32>
    %494 = arith.addf %493, %492 : vector<16x8xf32>
    %cst_278 = arith.constant 1.000000e+00 : f32
    %495 = vector.broadcast %cst_278 : f32 to vector<16x8xf32>
    %496 = arith.divf %495, %494 : vector<16x8xf32>
    %497 = vector.extract_strided_slice %479 {offsets = [0, 16], sizes = [16, 8], strides = [1, 1]} : vector<16x32xf32> to vector<16x8xf32>
    %cst_279 = arith.constant 0.000000e+00 : f32
    %498 = vector.broadcast %cst_279 : f32 to vector<16x8xf32>
    %499 = arith.subf %498, %497 : vector<16x8xf32>
    %500 = math.exp %499 : vector<16x8xf32>
    %cst_280 = arith.constant 1.000000e+00 : f32
    %501 = vector.broadcast %cst_280 : f32 to vector<16x8xf32>
    %502 = arith.addf %501, %500 : vector<16x8xf32>
    %cst_281 = arith.constant 1.000000e+00 : f32
    %503 = vector.broadcast %cst_281 : f32 to vector<16x8xf32>
    %504 = arith.divf %503, %502 : vector<16x8xf32>
    %505 = vector.extract_strided_slice %479 {offsets = [0, 24], sizes = [16, 8], strides = [1, 1]} : vector<16x32xf32> to vector<16x8xf32>
    %506 = math.tanh %505 : vector<16x8xf32>
    %507 = arith.mulf %496, %480 : vector<16x8xf32>
    %508 = arith.mulf %488, %506 : vector<16x8xf32>
    %509 = arith.addf %507, %508 : vector<16x8xf32>
    %510 = math.tanh %509 : vector<16x8xf32>
    %511 = arith.mulf %504, %510 : vector<16x8xf32>
    %c0_282 = arith.constant 0 : index
    %c0_283 = arith.constant 0 : index
    %512 = vector.load %arg14[%c0_282, %c0_283] : memref<16x8xf32, #tpu.memory_space<vmem>>, vector<16x8xf32>
    tpu.vector_store %arg14[%c0_282, %c0_283], %511 {strides = array<i32>} : memref<16x8xf32, #tpu.memory_space<vmem>>, vector<16x8xf32>,
    %c0_284 = arith.constant 0 : index
    %c0_285 = arith.constant 0 : index
    %513 = vector.load %arg15[%c0_284, %c0_285] : memref<16x8xf32, #tpu.memory_space<vmem>>, vector<16x8xf32>
    tpu.vector_store %arg15[%c0_284, %c0_285], %509 {strides = array<i32>} : memref<16x8xf32, #tpu.memory_space<vmem>>, vector<16x8xf32>,
    %514 = arith.index_cast %c4_i32_266 : i32 to index
    %c0_286 = arith.constant 0 : index
    %c0_287 = arith.constant 0 : index
    %515 = vector.load %arg11[%514, %c0_286, %c0_287] : memref<5x16x8xf32, #tpu.memory_space<vmem>>, vector<1x16x8xf32>
    %516 = vector.shape_cast %515 : vector<1x16x8xf32> to vector<16x8xf32>
    %517 = vector.shape_cast %511 : vector<16x8xf32> to vector<1x16x8xf32>
    tpu.vector_store %arg11[%514, %c0_286, %c0_287], %517 {strides = array<i32>} : memref<5x16x8xf32, #tpu.memory_space<vmem>>, vector<1x16x8xf32>,
    %c5_i32_288 = arith.constant 5 : i32
    return
  }
}

</mosaic_0001>

<bundles_post_ra>
// kernel: gconvlstm_seq2seq.1
= control target key start
LH: loop header
LB: loop body
LE: loop exit
PB: predicated region body
PF: predicated region fallthrough
CT: control target
= control target key end

     0   :  { %vm50_vm0 = vcmask 130048   ;;  %vm43_vm1 = vcmask 64512   ;;  %v4743_v3 = vmov 0.0   ;;  %vm297_vm2 = vcmask 1043456   ;;  %s4744_s29 = smov 8   ;;  %s4745_s30 = smov 104   ;;  %s5313_s0 = inlined_call_operand.vmem [shape: f32[6,16,4], index: 0, kind: input, shape index: {}]   ;;  %s5314_s1 = inlined_call_operand.vmem [shape: f32[16,16], index: 1, kind: input, shape index: {}]   ;;  %s5315_s2 = inlined_call_operand.vmem [shape: f32[4,32], index: 2, kind: input, shape index: {}]   ;;  %s5316_s3 = inlined_call_operand.vmem [shape: f32[8,32], index: 3, kind: input, shape index: {}]   ;;  %s5317_s4 = inlined_call_operand.vmem [shape: f32[1,32], index: 4, kind: input, shape index: {}]   ;;  %s5318_s6 = inlined_call_operand.vmem [shape: f32[8,16], index: 6, kind: input, shape index: {}]   ;;  %s5319_s5 = inlined_call_operand.vmem [shape: f32[8,16], index: 5, kind: input, shape index: {}]   ;;  %s5320_s8 = inlined_call_operand.vmem [shape: f32[8,32], index: 8, kind: input, shape index: {}]   ;;  %s5321_s7 = inlined_call_operand.vmem [shape: f32[1,16], index: 7, kind: input, shape index: {}]   ;;  %s5322_s9 = inlined_call_operand.vmem [shape: f32[8,32], index: 9, kind: input, shape index: {}]   ;;  %s5323_s10 = inlined_call_operand.vmem [shape: f32[1,32], index: 10, kind: input, shape index: {}]   ;;  %s5324_s11 = inlined_call_operand.vmem [shape: f32[5,16,8], index: 11, kind: output, shape index: {}]  }
   0x1   :  { %v49_v0 = vld [vmem:[%s5313_s0 + $0x8] sm:$0xff]  ;;  %v48_v1 = vld [vmem:[%s5313_s0] sm:$0xff]  ;;  %45 = vst.msk [vmem:[#allocation2 + $0x8] sm:$0xff] %vm43_vm1, %v4743_v3  ;;  %44 = vst.msk [vmem:[#allocation2] sm:$0xff] %vm43_vm1, %v4743_v3  ;;  %vm290_vm3 = vcmask 31744   ;;  %s4746_s15 = smov 112  }
   0x2   :  { %v4817_v2 = vld [vmem:[%s5314_s1] sm:$0xff]  ;;  %46 = vst.msk [vmem:[#allocation3] sm:$0xff] %vm43_vm1, %v4743_v3  ;;  %47 = vst.msk [vmem:[#allocation3 + $0x8] sm:$0xff] %vm43_vm1, %v4743_v3  ;;  %4323 = vmatprep.subr.mxu0 %v49_v0  ;;  %v4828_v4 = vld [vmem:[%s5314_s1 + $0x8] sm:$0xff]  ;;  %s4747_s16 = smov 120  }
   0x3   :  { %4327 = vmatprep.mubr.msk.f32.mxu0 %vm50_vm0, %v4817_v2  ;;  %4324 = vmatpush3.msra.mxu0 %v49_v0  ;;  %v4839_v7 = vld [vmem:[%s5315_s2] sm:$0xf]  ;;  %v4091_v50 = vld [vmem:[%s5313_s0 + $0x18] sm:$0xff]  ;;  %v4090_v51 = vld [vmem:[%s5313_s0 + $0x10] sm:$0xff] }
   0x4   :  { %4334 = vmatprep.mubr.msk.f32.mxu1 %vm50_vm0, %v4817_v2  ;;  %4325 = vmatprep.subr.mxu0 %v48_v1  ;;  %v4848_v8 = vld [vmem:[%s5316_s3] sm:$0xff] }
   0x5   :  { %4326 = vmatpush3.msra.mxu0 %v48_v1  ;;  %v4865_v16 = vld [vmem:[%s5317_s4] ss:$0 sm:$0xff] }
   0x6   :  { %4328 = vmatmul.mubr.msk.f32.vlgmr.msra.gmra.mxu0 %vm50_vm0, %v4828_v4  ;;  %4337 = vmatprep.subr.mxu0 %v4848_v8 }
   0x7   :  { %4338 = vmatpush3.msra.mxu0 %v4848_v8 }
   0x8   :  { %v133_v5 = vld [vmem:[#allocation2 + $0x8] sm:$0xff]  ;;  %v132_v6 = vld [vmem:[#allocation2] sm:$0xff]  ;;  %4347 = vmatprep.subr.mxu0 %v4091_v50 }
   0x9   :  { %4330 = vmatprep.subr.mxu1 %v133_v5  ;;  %v385_v9 = vld [vmem:[#allocation3 + $0x8] sm:$0xff]  ;;  %v384_v10 = vld [vmem:[#allocation3] sm:$0xff] }
   0xa   :  { %4331 = vmatpush3.msra.mxu1 %v133_v5  ;;  %404 = vrot.lane.b32.xlu1 %v385_v9, %s4744_s29 }
   0xb   :  { %4332 = vmatprep.subr.mxu1 %v132_v6 }
   0xc   :  { %4333 = vmatpush3.msra.mxu1 %v132_v6 }
   0xd   :  { %4335 = vmatmul.mubr.msk.f32.vlgmr.msra.gmra.mxu1 %vm50_vm0, %v4828_v4  ;;  %4342 = vmatprep.subr.msk.mxu1 %vm297_vm2, %v4839_v7 }
   0xe   :  { %4343 = vmatpush3.msk.msra.mxu1 %vm297_vm2, %v4839_v7  ;;  %402 = vrot.lane.b32.xlu1 %v384_v10, %s4744_s29 }
  0x7c   :  { %v405_v40 = vpop.permute.xlu1 %404 }
  0x80   :  { %v403_v42 = vpop.permute.xlu1 %402 }
  0xc6   :  { %v4329_v11 = vpop.f32.mrf.mxu0 }
  0xc8   :  { %v123_v12 = vpop.f32.mrf.mxu0 }
  0xc9   :  { %4344 = vmatprep.mubr.msk.f32.mxu1 %vm290_vm3, %v123_v12 }
  0xca   :  { %4345 = vmatmul.mubr.msk.f32.vlgmr.msra.gmra.mxu1 %vm290_vm3, %v4329_v11 }
  0xcb   :  { %4358 = vmatprep.mubr.msk.f32.mxu1 %vm50_vm0, %v4817_v2 }
  0xcd   :  { %v4336_v13 = vpop.f32.mrf.mxu1 }
  0xcf   :  { %v200_v14 = vpop.f32.mrf.mxu1 }
  0xd0   :  { %4339 = vmatprep.mubr.msk.f32.mxu0 %vm43_vm1, %v200_v14 }
  0xd1   :  { %4340 = vmatmul.mubr.msk.f32.vlgmr.msra.gmra.mxu0 %vm43_vm1, %v4336_v13 }
  0xd2   :  { %4351 = vmatprep.mubr.msk.f32.mxu0 %vm50_vm0, %v4817_v2  ;;  %4348 = vmatpush3.msra.mxu0 %v4091_v50 }
  0xd3   :  { %4349 = vmatprep.subr.mxu0 %v4090_v51 }
  0xd4   :  { %4350 = vmatpush3.msra.mxu0 %v4090_v51 }
  0xd5   :  { %4352 = vmatmul.mubr.msk.f32.vlgmr.msra.gmra.mxu0 %vm50_vm0, %v4828_v4  ;;  %4361 = vmatprep.subr.mxu0 %v4848_v8 }
  0xd6   :  { %4362 = vmatpush3.msra.mxu0 %v4848_v8 }
 0x18a   :  { %v4346_v15 = vpop.f32.mrf.mxu1 }
 0x18c   :  { %v367_v19 = vpop.f32.mrf.mxu1 }
 0x191   :  { %v4341_v17 = vpop.f32.mrf.mxu0 }
 0x192   :  { %v373_v18 = vadd.f32 %v4346_v15, %v4341_v17 }
 0x193   :  { %v281_v20 = vpop.f32.mrf.mxu0 }
 0x194   :  { %v383_v21 = vadd.f32 %v4865_v16, %v373_v18  ;;  %v368_v22 = vadd.f32 %v367_v19, %v281_v20 }
 0x195   :  { %v4353_v62 = vpop.f32.mrf.mxu0 }
 0x196   :  { %4561 = vtanh.f32 %v383_v21  ;;  %v382_v23 = vadd.f32 %v4865_v16, %v368_v22  ;;  %v387_v26 = vsub.f32 0.0, %v383_v21 }
 0x197   :  { %v531_v63 = vpop.f32.mrf.mxu0 }
 0x198   :  { %4563 = vtanh.f32 %v382_v23  ;;  %v390_v27 = vmul.f32 1.442695, %v387_v26  ;;  %v386_v28 = vsub.f32 0.0, %v382_v23 }
 0x19a   :  { %4565 = vpow2.f32 %v390_v27  ;;  %v388_v29 = vmul.f32 1.442695, %v386_v28 }
 0x19c   :  { %4567 = vpow2.f32 %v388_v29 }
 0x1a3   :  { %v4562_v24 = vpop.eup %4561 }
 0x1a4   :  { %414 = vrot.lane.b32.xlu0 %v4562_v24, %s4745_s30 }
 0x1a5   :  { %v4564_v25 = vpop.eup %4563 }
 0x1a7   :  { %v4566_v30 = vpop.eup %4565 }
 0x1a8   :  { %412 = vrot.lane.b32.xlu0 %v4564_v25, %s4745_s30  ;;  %v393_v31 = vadd.f32 1.0, %v4566_v30 }
 0x1a9   :  { %v4568_v32 = vpop.eup %4567 }
 0x1aa   :  { %4569 = vrcp.f32 %v393_v31  ;;  %v392_v33 = vadd.f32 1.0, %v4568_v32 }
 0x1ac   :  { %4571 = vrcp.f32 %v392_v33 }
 0x1b7   :  { %v4570_v34 = vpop.eup %4569 }
 0x1b8   :  { %v409_v41 = vmul.f32 %v4570_v34, %v405_v40 }
 0x1b9   :  { %v4572_v37 = vpop.eup %4571 }
 0x1ba   :  { %v408_v45 = vmul.f32 %v4572_v37, %v403_v42 }
 0x216   :  { %v415_v35 = vpop.permute.xlu0 %414 }
 0x217   :  { %v419_v36 = vmul.f32 %v4570_v34, %v415_v35 }
 0x219   :  { %424 = vrot.lane.b32.xlu0 %v419_v36, %s4744_s29 }
 0x21a   :  { %v413_v38 = vpop.permute.xlu0 %412 }
 0x21b   :  { %v418_v39 = vmul.f32 %v4572_v37, %v413_v38 }
 0x21d   :  { %422 = vrot.lane.b32.xlu1 %v418_v39, %s4744_s29 }
 0x28b   :  { %v425_v43 = vpop.permute.xlu0 %424 }
 0x28c   :  { %v429_v44 = vadd.f32 %v425_v43, %v409_v41  ;;  %v4102_v43 = vld [vmem:[%s5313_s0 + $0x28] sm:$0xff] }
 0x28d   :  { %4371 = vmatprep.subr.mxu0 %v4102_v43 }
 0x28e   :  { %4573 = vtanh.f32 %v429_v44 }
 0x28f   :  { %v423_v46 = vpop.permute.xlu1 %422 }
 0x290   :  { %v428_v47 = vadd.f32 %v423_v46, %v408_v45 }
 0x292   :  { %4575 = vtanh.f32 %v428_v47 }
 0x29b   :  { %v4574_v48 = vpop.eup %4573 }
 0x29c   :  { %436 = vrot.lane.b32.xlu0 %v4574_v48, %s4744_s29 }
 0x29f   :  { %v4576_v49 = vpop.eup %4575 }
 0x2a0   :  { %434 = vrot.lane.b32.xlu1 %v4576_v49, %s4744_s29 }
 0x30e   :  { %v437_v52 = vpop.permute.xlu0 %436 }
 0x30f   :  { %v441_v53 = vmul.f32 %v4570_v34, %v437_v52 }
 0x311   :  { %446 = vrot.lane.b32.xlu0 %v441_v53, %s4746_s15 }
 0x312   :  { %v435_v54 = vpop.permute.xlu1 %434 }
 0x313   :  { %v440_v55 = vmul.f32 %v4572_v37, %v435_v54 }
 0x315   :  { %456 = vrot.lane.b32.xlu0 %v429_v44, %s4747_s16  ;;  %444 = vrot.lane.b32.xlu1 %v440_v55, %s4746_s15  ;;  %v4101_v44 = vld [vmem:[%s5313_s0 + $0x20] sm:$0xff] }
 0x319   :  { %454 = vrot.lane.b32.xlu1 %v428_v47, %s4747_s16 }
 0x383   :  { %v447_v56 = vpop.permute.xlu0 %446 }
 0x384   :  { %451 = vst.msk [vmem:[#allocation2 + $0x8] sm:$0xff] %vm43_vm1, %v447_v56 }
 0x387   :  { %v457_v57 = vpop.permute.xlu0 %456  ;;  %v445_v58 = vpop.permute.xlu1 %444 }
 0x388   :  { %461 = vst.msk [vmem:[#allocation3 + $0x8] sm:$0xff] %vm43_vm1, %v457_v57  ;;  %450 = vst.msk [vmem:[#allocation2] sm:$0xff] %vm43_vm1, %v445_v58 }
 0x38b   :  { %v455_v59 = vpop.permute.xlu1 %454  ;;  %v541_v60 = vld [vmem:[#allocation2 + $0x8] sm:$0xff] }
 0x38c   :  { %460 = vst.msk [vmem:[#allocation3] sm:$0xff] %vm43_vm1, %v455_v59  ;;  %4354 = vmatprep.subr.mxu1 %v541_v60 }
 0x38d   :  { %4355 = vmatpush3.msra.mxu1 %v541_v60 }
 0x38f   :  { %v540_v61 = vld [vmem:[#allocation2] sm:$0xff]  ;;  %v782_v17 = vld [vmem:[#allocation3 + $0x8] sm:$0xff] }
 0x390   :  { %4356 = vmatprep.subr.mxu1 %v540_v61 }
 0x391   :  { %4357 = vmatpush3.msra.mxu1 %v540_v61 }
 0x392   :  { %4359 = vmatmul.mubr.msk.f32.vlgmr.msra.gmra.mxu1 %vm50_vm0, %v4828_v4  ;;  %4366 = vmatprep.subr.msk.mxu1 %vm297_vm2, %v4839_v7 }
 0x393   :  { %4367 = vmatpush3.msk.msra.mxu1 %vm297_vm2, %v4839_v7  ;;  %4368 = vmatprep.mubr.msk.f32.mxu1 %vm290_vm3, %v531_v63  ;;  %v781_v18 = vld [vmem:[#allocation3] sm:$0xff] }
 0x396   :  { %4369 = vmatmul.mubr.msk.f32.vlgmr.msra.gmra.mxu1 %vm290_vm3, %v4353_v62 }
 0x397   :  { %4382 = vmatprep.mubr.msk.f32.mxu1 %vm50_vm0, %v4817_v2 }
 0x452   :  { %v4360_v0 = vpop.f32.mrf.mxu1 }
 0x454   :  { %v608_v1 = vpop.f32.mrf.mxu1 }
 0x455   :  { %4363 = vmatprep.mubr.msk.f32.mxu0 %vm43_vm1, %v608_v1 }
 0x456   :  { %4364 = vmatmul.mubr.msk.f32.vlgmr.msra.gmra.mxu0 %vm43_vm1, %v4360_v0  ;;  %v4370_v3 = vpop.f32.mrf.mxu1 }
 0x457   :  { %4375 = vmatprep.mubr.msk.f32.mxu0 %vm50_vm0, %v4817_v2  ;;  %4372 = vmatpush3.msra.mxu0 %v4102_v43 }
 0x458   :  { %v770_v9 = vpop.f32.mrf.mxu1  ;;  %4373 = vmatprep.subr.mxu0 %v4101_v44 }
 0x459   :  { %4374 = vmatpush3.msra.mxu0 %v4101_v44 }
 0x45a   :  { %4376 = vmatmul.mubr.msk.f32.vlgmr.msra.gmra.mxu0 %vm50_vm0, %v4828_v4  ;;  %4385 = vmatprep.subr.mxu0 %v4848_v8 }
 0x45b   :  { %4386 = vmatpush3.msra.mxu0 %v4848_v8 }
 0x516   :  { %v4365_v5 = vpop.f32.mrf.mxu0 }
 0x517   :  { %v776_v6 = vadd.f32 %v4370_v3, %v4365_v5 }
 0x518   :  { %v689_v10 = vpop.f32.mrf.mxu0 }
 0x519   :  { %v780_v11 = vadd.f32 %v4865_v16, %v776_v6  ;;  %v771_v12 = vadd.f32 %v770_v9, %v689_v10 }
 0x51a   :  { %v4377_v55 = vpop.f32.mrf.mxu0 }
 0x51b   :  { %4577 = vtanh.f32 %v780_v11  ;;  %v779_v13 = vadd.f32 %v4865_v16, %v771_v12  ;;  %v784_v19 = vsub.f32 0.0, %v780_v11 }
 0x51c   :  { %v928_v56 = vpop.f32.mrf.mxu0 }
 0x51d   :  { %4579 = vtanh.f32 %v779_v13  ;;  %v783_v20 = vsub.f32 0.0, %v779_v13  ;;  %v787_v21 = vmul.f32 1.442695, %v784_v19 }
 0x51f   :  { %v785_v22 = vmul.f32 1.442695, %v783_v20  ;;  %4581 = vpow2.f32 %v787_v21 }
 0x521   :  { %4583 = vpow2.f32 %v785_v22 }
 0x528   :  { %v4578_v14 = vpop.eup %4577 }
 0x529   :  { %811 = vrot.lane.b32.xlu0 %v4578_v14, %s4745_s30 }
 0x52a   :  { %v4580_v15 = vpop.eup %4579 }
 0x52b   :  { %809 = vrot.lane.b32.xlu1 %v4580_v15, %s4745_s30 }
 0x52c   :  { %v4582_v23 = vpop.eup %4581 }
 0x52d   :  { %801 = vrot.lane.b32.xlu0 %v782_v17, %s4744_s29  ;;  %v790_v25 = vadd.f32 1.0, %v4582_v23 }
 0x52e   :  { %v4584_v24 = vpop.eup %4583 }
 0x52f   :  { %799 = vrot.lane.b32.xlu1 %v781_v18, %s4744_s29  ;;  %v789_v26 = vadd.f32 1.0, %v4584_v24  ;;  %4585 = vrcp.f32 %v790_v25 }
 0x531   :  { %4587 = vrcp.f32 %v789_v26 }
 0x53c   :  { %v4586_v27 = vpop.eup %4585 }
 0x53e   :  { %v4588_v30 = vpop.eup %4587 }
 0x59b   :  { %v812_v28 = vpop.permute.xlu0 %811 }
 0x59c   :  { %v816_v29 = vmul.f32 %v4586_v27, %v812_v28 }
 0x59d   :  { %v810_v31 = vpop.permute.xlu1 %809 }
 0x59e   :  { %v815_v32 = vmul.f32 %v4588_v30, %v810_v31  ;;  %821 = vrot.lane.b32.xlu0 %v816_v29, %s4744_s29 }
 0x59f   :  { %v802_v33 = vpop.permute.xlu0 %801 }
 0x5a0   :  { %819 = vrot.lane.b32.xlu1 %v815_v32, %s4744_s29  ;;  %v806_v35 = vmul.f32 %v4586_v27, %v802_v33 }
 0x5a1   :  { %v800_v34 = vpop.permute.xlu1 %799 }
 0x5a2   :  { %v805_v37 = vmul.f32 %v4588_v30, %v800_v34 }
 0x610   :  { %v822_v36 = vpop.permute.xlu0 %821 }
 0x611   :  { %v826_v38 = vadd.f32 %v822_v36, %v806_v35  ;;  %v4113_v36 = vld [vmem:[%s5313_s0 + $0x38] sm:$0xff] }
 0x612   :  { %v820_v39 = vpop.permute.xlu1 %819  ;;  %4395 = vmatprep.subr.mxu0 %v4113_v36 }
 0x613   :  { %4589 = vtanh.f32 %v826_v38  ;;  %v825_v40 = vadd.f32 %v820_v39, %v805_v37  ;;  %v4112_v37 = vld [vmem:[%s5313_s0 + $0x30] sm:$0xff] }
 0x615   :  { %4591 = vtanh.f32 %v825_v40 }
 0x620   :  { %v4590_v41 = vpop.eup %4589 }
 0x621   :  { %833 = vrot.lane.b32.xlu0 %v4590_v41, %s4744_s29 }
 0x622   :  { %v4592_v42 = vpop.eup %4591 }
 0x623   :  { %831 = vrot.lane.b32.xlu1 %v4592_v42, %s4744_s29 }
 0x693   :  { %v834_v45 = vpop.permute.xlu0 %833 }
 0x694   :  { %v838_v46 = vmul.f32 %v4586_v27, %v834_v45 }
 0x695   :  { %v832_v47 = vpop.permute.xlu1 %831 }
 0x696   :  { %v837_v48 = vmul.f32 %v4588_v30, %v832_v47  ;;  %843 = vrot.lane.b32.xlu0 %v838_v46, %s4746_s15 }
 0x698   :  { %841 = vrot.lane.b32.xlu1 %v837_v48, %s4746_s15 }
 0x69a   :  { %853 = vrot.lane.b32.xlu0 %v826_v38, %s4747_s16 }
 0x69c   :  { %851 = vrot.lane.b32.xlu1 %v825_v40, %s4747_s16 }
 0x708   :  { %v844_v49 = vpop.permute.xlu0 %843 }
 0x709   :  { %848 = vst.msk [vmem:[#allocation2 + $0x8] sm:$0xff] %vm43_vm1, %v844_v49 }
 0x70a   :  { %v842_v50 = vpop.permute.xlu1 %841 }
 0x70b   :  { %847 = vst.msk [vmem:[#allocation2] sm:$0xff] %vm43_vm1, %v842_v50 }
 0x70c   :  { %v854_v51 = vpop.permute.xlu0 %853 }
 0x70d   :  { %858 = vst.msk [vmem:[#allocation3 + $0x8] sm:$0xff] %vm43_vm1, %v854_v51 }
 0x70e   :  { %v852_v52 = vpop.permute.xlu1 %851 }
 0x70f   :  { %857 = vst.msk [vmem:[#allocation3] sm:$0xff] %vm43_vm1, %v852_v52 }
 0x710   :  { %v938_v53 = vld [vmem:[#allocation2 + $0x8] sm:$0xff] }
 0x711   :  { %4378 = vmatprep.subr.mxu1 %v938_v53 }
 0x712   :  { %4379 = vmatpush3.msra.mxu1 %v938_v53  ;;  %v937_v54 = vld [vmem:[#allocation2] sm:$0xff] }
 0x713   :  { %4380 = vmatprep.subr.mxu1 %v937_v54 }
 0x714   :  { %4381 = vmatpush3.msra.mxu1 %v937_v54  ;;  %v1179_v9 = vld [vmem:[#allocation3 + $0x8] sm:$0xff] }
 0x715   :  { %4383 = vmatmul.mubr.msk.f32.vlgmr.msra.gmra.mxu1 %vm50_vm0, %v4828_v4  ;;  %4390 = vmatprep.subr.msk.mxu1 %vm297_vm2, %v4839_v7 }
 0x716   :  { %4391 = vmatpush3.msk.msra.mxu1 %vm297_vm2, %v4839_v7  ;;  %4392 = vmatprep.mubr.msk.f32.mxu1 %vm290_vm3, %v928_v56  ;;  %v1178_v10 = vld [vmem:[#allocation3] sm:$0xff] }
 0x719   :  { %4393 = vmatmul.mubr.msk.f32.vlgmr.msra.gmra.mxu1 %vm290_vm3, %v4377_v55 }
 0x71a   :  { %4406 = vmatprep.mubr.msk.f32.mxu1 %vm50_vm0, %v4817_v2 }
 0x7d5   :  { %v4384_v57 = vpop.f32.mrf.mxu1 }
 0x7d7   :  { %v1005_v58 = vpop.f32.mrf.mxu1 }
 0x7d8   :  { %4387 = vmatprep.mubr.msk.f32.mxu0 %vm43_vm1, %v1005_v58 }
 0x7d9   :  { %4388 = vmatmul.mubr.msk.f32.vlgmr.msra.gmra.mxu0 %vm43_vm1, %v4384_v57  ;;  %v4394_v59 = vpop.f32.mrf.mxu1 }
 0x7da   :  { %4399 = vmatprep.mubr.msk.f32.mxu0 %vm50_vm0, %v4817_v2  ;;  %4396 = vmatpush3.msra.mxu0 %v4113_v36 }
 0x7db   :  { %v1167_v62 = vpop.f32.mrf.mxu1  ;;  %4397 = vmatprep.subr.mxu0 %v4112_v37 }
 0x7dc   :  { %4398 = vmatpush3.msra.mxu0 %v4112_v37 }
 0x7dd   :  { %4400 = vmatmul.mubr.msk.f32.vlgmr.msra.gmra.mxu0 %vm50_vm0, %v4828_v4  ;;  %4409 = vmatprep.subr.mxu0 %v4848_v8 }
 0x7de   :  { %4410 = vmatpush3.msra.mxu0 %v4848_v8 }
 0x899   :  { %v4389_v60 = vpop.f32.mrf.mxu0 }
 0x89a   :  { %v1173_v61 = vadd.f32 %v4394_v59, %v4389_v60 }
 0x89b   :  { %v1086_v63 = vpop.f32.mrf.mxu0 }
 0x89c   :  { %v1177_v0 = vadd.f32 %v4865_v16, %v1173_v61  ;;  %v1168_v1 = vadd.f32 %v1167_v62, %v1086_v63 }
 0x89d   :  { %v4401_v48 = vpop.f32.mrf.mxu0 }
 0x89e   :  { %4593 = vtanh.f32 %v1177_v0  ;;  %v1176_v3 = vadd.f32 %v4865_v16, %v1168_v1  ;;  %v1181_v11 = vsub.f32 0.0, %v1177_v0 }
 0x89f   :  { %v1325_v49 = vpop.f32.mrf.mxu0 }
 0x8a0   :  { %4595 = vtanh.f32 %v1176_v3  ;;  %v1180_v12 = vsub.f32 0.0, %v1176_v3  ;;  %v1184_v13 = vmul.f32 1.442695, %v1181_v11 }
 0x8a2   :  { %v1182_v14 = vmul.f32 1.442695, %v1180_v12  ;;  %4597 = vpow2.f32 %v1184_v13 }
 0x8a4   :  { %4599 = vpow2.f32 %v1182_v14 }
 0x8ab   :  { %v4594_v5 = vpop.eup %4593 }
 0x8ac   :  { %1208 = vrot.lane.b32.xlu0 %v4594_v5, %s4745_s30 }
 0x8ad   :  { %v4596_v6 = vpop.eup %4595 }
 0x8ae   :  { %1206 = vrot.lane.b32.xlu1 %v4596_v6, %s4745_s30 }
 0x8af   :  { %v4598_v15 = vpop.eup %4597 }
 0x8b0   :  { %1198 = vrot.lane.b32.xlu0 %v1179_v9, %s4744_s29  ;;  %v1187_v18 = vadd.f32 1.0, %v4598_v15 }
 0x8b1   :  { %v4600_v17 = vpop.eup %4599 }
 0x8b2   :  { %1196 = vrot.lane.b32.xlu1 %v1178_v10, %s4744_s29  ;;  %v1186_v19 = vadd.f32 1.0, %v4600_v17  ;;  %4601 = vrcp.f32 %v1187_v18 }
 0x8b4   :  { %4603 = vrcp.f32 %v1186_v19 }
 0x8bf   :  { %v4602_v20 = vpop.eup %4601 }
 0x8c1   :  { %v4604_v23 = vpop.eup %4603 }
 0x91e   :  { %v1209_v21 = vpop.permute.xlu0 %1208 }
 0x91f   :  { %v1213_v22 = vmul.f32 %v4602_v20, %v1209_v21 }
 0x920   :  { %v1207_v24 = vpop.permute.xlu1 %1206 }
 0x921   :  { %v1212_v25 = vmul.f32 %v4604_v23, %v1207_v24  ;;  %1218 = vrot.lane.b32.xlu0 %v1213_v22, %s4744_s29 }
 0x922   :  { %v1199_v26 = vpop.permute.xlu0 %1198 }
 0x923   :  { %1216 = vrot.lane.b32.xlu1 %v1212_v25, %s4744_s29  ;;  %v1203_v28 = vmul.f32 %v4602_v20, %v1199_v26 }
 0x924   :  { %v1197_v27 = vpop.permute.xlu1 %1196 }
 0x925   :  { %v1202_v30 = vmul.f32 %v4604_v23, %v1197_v27 }
 0x993   :  { %v1219_v29 = vpop.permute.xlu0 %1218 }
 0x994   :  { %v1223_v31 = vadd.f32 %v1219_v29, %v1203_v28  ;;  %v4124_v29 = vld [vmem:[%s5313_s0 + $0x48] sm:$0xff] }
 0x995   :  { %v1217_v32 = vpop.permute.xlu1 %1216  ;;  %4419 = vmatprep.subr.mxu0 %v4124_v29 }
 0x996   :  { %4605 = vtanh.f32 %v1223_v31  ;;  %v1222_v33 = vadd.f32 %v1217_v32, %v1202_v30  ;;  %v4123_v30 = vld [vmem:[%s5313_s0 + $0x40] sm:$0xff] }
 0x998   :  { %4607 = vtanh.f32 %v1222_v33 }
 0x9a3   :  { %v4606_v34 = vpop.eup %4605 }
 0x9a4   :  { %1230 = vrot.lane.b32.xlu0 %v4606_v34, %s4744_s29 }
 0x9a5   :  { %v4608_v35 = vpop.eup %4607 }
 0x9a6   :  { %1228 = vrot.lane.b32.xlu1 %v4608_v35, %s4744_s29 }
 0xa16   :  { %v1231_v38 = vpop.permute.xlu0 %1230 }
 0xa17   :  { %v1235_v39 = vmul.f32 %v4602_v20, %v1231_v38 }
 0xa18   :  { %v1229_v40 = vpop.permute.xlu1 %1228 }
 0xa19   :  { %v1234_v41 = vmul.f32 %v4604_v23, %v1229_v40  ;;  %1240 = vrot.lane.b32.xlu0 %v1235_v39, %s4746_s15 }
 0xa1b   :  { %1238 = vrot.lane.b32.xlu1 %v1234_v41, %s4746_s15 }
 0xa1d   :  { %1250 = vrot.lane.b32.xlu0 %v1223_v31, %s4747_s16 }
 0xa1f   :  { %1248 = vrot.lane.b32.xlu1 %v1222_v33, %s4747_s16 }
 0xa8b   :  { %v1241_v42 = vpop.permute.xlu0 %1240 }
 0xa8c   :  { %1245 = vst.msk [vmem:[#allocation2 + $0x8] sm:$0xff] %vm43_vm1, %v1241_v42 }
 0xa8d   :  { %v1239_v43 = vpop.permute.xlu1 %1238 }
 0xa8e   :  { %1244 = vst.msk [vmem:[#allocation2] sm:$0xff] %vm43_vm1, %v1239_v43 }
 0xa8f   :  { %v1251_v44 = vpop.permute.xlu0 %1250 }
 0xa90   :  { %1255 = vst.msk [vmem:[#allocation3 + $0x8] sm:$0xff] %vm43_vm1, %v1251_v44 }
 0xa91   :  { %v1249_v45 = vpop.permute.xlu1 %1248 }
 0xa92   :  { %1254 = vst.msk [vmem:[#allocation3] sm:$0xff] %vm43_vm1, %v1249_v45 }
 0xa93   :  { %v1335_v46 = vld [vmem:[#allocation2 + $0x8] sm:$0xff] }
 0xa94   :  { %4402 = vmatprep.subr.mxu1 %v1335_v46 }
 0xa95   :  { %4403 = vmatpush3.msra.mxu1 %v1335_v46  ;;  %v1334_v47 = vld [vmem:[#allocation2] sm:$0xff] }
 0xa96   :  { %4404 = vmatprep.subr.mxu1 %v1334_v47 }
 0xa97   :  { %4405 = vmatpush3.msra.mxu1 %v1334_v47  ;;  %v1576_v62 = vld [vmem:[#allocation3 + $0x8] sm:$0xff] }
 0xa98   :  { %4407 = vmatmul.mubr.msk.f32.vlgmr.msra.gmra.mxu1 %vm50_vm0, %v4828_v4  ;;  %4414 = vmatprep.subr.msk.mxu1 %vm297_vm2, %v4839_v7 }
 0xa99   :  { %4415 = vmatpush3.msk.msra.mxu1 %vm297_vm2, %v4839_v7  ;;  %4416 = vmatprep.mubr.msk.f32.mxu1 %vm290_vm3, %v1325_v49  ;;  %v1575_v63 = vld [vmem:[#allocation3] sm:$0xff] }
 0xa9c   :  { %4417 = vmatmul.mubr.msk.f32.vlgmr.msra.gmra.mxu1 %vm290_vm3, %v4401_v48 }
 0xa9d   :  { %4430 = vmatprep.mubr.msk.f32.mxu1 %vm50_vm0, %v4817_v2 }
 0xb58   :  { %v4408_v50 = vpop.f32.mrf.mxu1 }
 0xb5a   :  { %v1402_v51 = vpop.f32.mrf.mxu1 }
 0xb5b   :  { %4411 = vmatprep.mubr.msk.f32.mxu0 %vm43_vm1, %v1402_v51 }
 0xb5c   :  { %4412 = vmatmul.mubr.msk.f32.vlgmr.msra.gmra.mxu0 %vm43_vm1, %v4408_v50  ;;  %v4418_v52 = vpop.f32.mrf.mxu1 }
 0xb5d   :  { %4423 = vmatprep.mubr.msk.f32.mxu0 %vm50_vm0, %v4817_v2  ;;  %4420 = vmatpush3.msra.mxu0 %v4124_v29 }
 0xb5e   :  { %v1564_v55 = vpop.f32.mrf.mxu1  ;;  %4421 = vmatprep.subr.mxu0 %v4123_v30 }
 0xb5f   :  { %4422 = vmatpush3.msra.mxu0 %v4123_v30 }
 0xb60   :  { %4424 = vmatmul.mubr.msk.f32.vlgmr.msra.gmra.mxu0 %vm50_vm0, %v4828_v4  ;;  %4433 = vmatprep.subr.mxu0 %v4848_v8 }
 0xb61   :  { %4434 = vmatpush3.msra.mxu0 %v4848_v8 }
 0xc1c   :  { %v4413_v53 = vpop.f32.mrf.mxu0 }
 0xc1d   :  { %v1570_v54 = vadd.f32 %v4418_v52, %v4413_v53 }
 0xc1e   :  { %v1483_v56 = vpop.f32.mrf.mxu0 }
 0xc1f   :  { %v1574_v57 = vadd.f32 %v4865_v16, %v1570_v54  ;;  %v1565_v58 = vadd.f32 %v1564_v55, %v1483_v56 }
 0xc20   :  { %v4425_v41 = vpop.f32.mrf.mxu0 }
 0xc21   :  { %4609 = vtanh.f32 %v1574_v57  ;;  %v1573_v59 = vadd.f32 %v4865_v16, %v1565_v58  ;;  %v1578_v0 = vsub.f32 0.0, %v1574_v57 }
 0xc22   :  { %v1722_v42 = vpop.f32.mrf.mxu0 }
 0xc23   :  { %4611 = vtanh.f32 %v1573_v59  ;;  %v1577_v1 = vsub.f32 0.0, %v1573_v59  ;;  %v1581_v3 = vmul.f32 1.442695, %v1578_v0 }
 0xc25   :  { %v1579_v5 = vmul.f32 1.442695, %v1577_v1  ;;  %4613 = vpow2.f32 %v1581_v3 }
 0xc27   :  { %4615 = vpow2.f32 %v1579_v5 }
 0xc2e   :  { %v4610_v60 = vpop.eup %4609 }
 0xc2f   :  { %1605 = vrot.lane.b32.xlu0 %v4610_v60, %s4745_s30 }
 0xc30   :  { %v4612_v61 = vpop.eup %4611 }
 0xc31   :  { %1603 = vrot.lane.b32.xlu1 %v4612_v61, %s4745_s30 }
 0xc32   :  { %v4614_v6 = vpop.eup %4613 }
 0xc33   :  { %1595 = vrot.lane.b32.xlu0 %v1576_v62, %s4744_s29  ;;  %v1584_v10 = vadd.f32 1.0, %v4614_v6 }
 0xc34   :  { %v4616_v9 = vpop.eup %4615 }
 0xc35   :  { %1593 = vrot.lane.b32.xlu1 %v1575_v63, %s4744_s29  ;;  %v1583_v11 = vadd.f32 1.0, %v4616_v9  ;;  %4617 = vrcp.f32 %v1584_v10 }
 0xc37   :  { %4619 = vrcp.f32 %v1583_v11 }
 0xc42   :  { %v4618_v12 = vpop.eup %4617 }
 0xc44   :  { %v4620_v15 = vpop.eup %4619 }
 0xca1   :  { %v1606_v13 = vpop.permute.xlu0 %1605 }
 0xca2   :  { %v1610_v14 = vmul.f32 %v4618_v12, %v1606_v13 }
 0xca3   :  { %v1604_v17 = vpop.permute.xlu1 %1603 }
 0xca4   :  { %v1609_v18 = vmul.f32 %v4620_v15, %v1604_v17  ;;  %1615 = vrot.lane.b32.xlu0 %v1610_v14, %s4744_s29 }
 0xca5   :  { %v1596_v19 = vpop.permute.xlu0 %1595 }
 0xca6   :  { %1613 = vrot.lane.b32.xlu1 %v1609_v18, %s4744_s29  ;;  %v1600_v21 = vmul.f32 %v4618_v12, %v1596_v19 }
 0xca7   :  { %v1594_v20 = vpop.permute.xlu1 %1593 }
 0xca8   :  { %v1599_v23 = vmul.f32 %v4620_v15, %v1594_v20 }
 0xd16   :  { %v1616_v22 = vpop.permute.xlu0 %1615 }
 0xd17   :  { %v1620_v24 = vadd.f32 %v1616_v22, %v1600_v21  ;;  %v4135_v21 = vld [vmem:[%s5313_s0 + $0x58] sm:$0xff]  ;;  %v4134_v22 = vld [vmem:[%s5313_s0 + $0x50] sm:$0xff] }
 0xd18   :  { %v1614_v25 = vpop.permute.xlu1 %1613  ;;  %4443 = vmatprep.subr.mxu0 %v4135_v21 }
 0xd19   :  { %4621 = vtanh.f32 %v1620_v24  ;;  %v1619_v26 = vadd.f32 %v1614_v25, %v1599_v23 }
 0xd1b   :  { %4623 = vtanh.f32 %v1619_v26 }
 0xd26   :  { %v4622_v27 = vpop.eup %4621 }
 0xd27   :  { %1627 = vrot.lane.b32.xlu0 %v4622_v27, %s4744_s29 }
 0xd28   :  { %v4624_v28 = vpop.eup %4623 }
 0xd29   :  { %1625 = vrot.lane.b32.xlu1 %v4624_v28, %s4744_s29 }
 0xd99   :  { %v1628_v31 = vpop.permute.xlu0 %1627 }
 0xd9a   :  { %v1632_v32 = vmul.f32 %v4618_v12, %v1628_v31 }
 0xd9b   :  { %v1626_v33 = vpop.permute.xlu1 %1625 }
 0xd9c   :  { %v1631_v34 = vmul.f32 %v4620_v15, %v1626_v33  ;;  %1637 = vrot.lane.b32.xlu0 %v1632_v32, %s4746_s15 }
 0xd9e   :  { %1635 = vrot.lane.b32.xlu1 %v1631_v34, %s4746_s15  ;;  %v5072_v34 = vld [vmem:[%s5314_s1] sm:$0xff] }
 0xda0   :  { %1647 = vrot.lane.b32.xlu0 %v1620_v24, %s4747_s16 }
 0xda2   :  { %1645 = vrot.lane.b32.xlu1 %v1619_v26, %s4747_s16 }
 0xe0e   :  { %v1638_v35 = vpop.permute.xlu0 %1637 }
 0xe0f   :  { %1642 = vst.msk [vmem:[#allocation2 + $0x8] sm:$0xff] %vm43_vm1, %v1638_v35 }
 0xe10   :  { %v1636_v36 = vpop.permute.xlu1 %1635 }
 0xe11   :  { %1641 = vst.msk [vmem:[#allocation2] sm:$0xff] %vm43_vm1, %v1636_v36 }
 0xe12   :  { %v1648_v37 = vpop.permute.xlu0 %1647 }
 0xe13   :  { %1652 = vst.msk [vmem:[#allocation3 + $0x8] sm:$0xff] %vm43_vm1, %v1648_v37 }
 0xe14   :  { %v1646_v38 = vpop.permute.xlu1 %1645 }
 0xe15   :  { %1651 = vst.msk [vmem:[#allocation3] sm:$0xff] %vm43_vm1, %v1646_v38 }
 0xe16   :  { %v1732_v39 = vld [vmem:[#allocation2 + $0x8] sm:$0xff] }
 0xe17   :  { %4426 = vmatprep.subr.mxu1 %v1732_v39 }
 0xe18   :  { %4427 = vmatpush3.msra.mxu1 %v1732_v39  ;;  %v1731_v40 = vld [vmem:[#allocation2] sm:$0xff] }
 0xe19   :  { %4428 = vmatprep.subr.mxu1 %v1731_v40 }
 0xe1a   :  { %4429 = vmatpush3.msra.mxu1 %v1731_v40  ;;  %v1973_v55 = vld [vmem:[#allocation3 + $0x8] sm:$0xff] }
 0xe1b   :  { %4431 = vmatmul.mubr.msk.f32.vlgmr.msra.gmra.mxu1 %vm50_vm0, %v4828_v4  ;;  %4438 = vmatprep.subr.msk.mxu1 %vm297_vm2, %v4839_v7 }
 0xe1c   :  { %4439 = vmatpush3.msk.msra.mxu1 %vm297_vm2, %v4839_v7  ;;  %4440 = vmatprep.mubr.msk.f32.mxu1 %vm290_vm3, %v1722_v42 }
 0xe1f   :  { %4441 = vmatmul.mubr.msk.f32.vlgmr.msra.gmra.mxu1 %vm290_vm3, %v4425_v41 }
 0xe20   :  { %4454 = vmatprep.mubr.msk.f32.mxu1 %vm50_vm0, %v4817_v2 }
 0xedb   :  { %v4432_v43 = vpop.f32.mrf.mxu1 }
 0xedd   :  { %v1799_v44 = vpop.f32.mrf.mxu1 }
 0xede   :  { %4435 = vmatprep.mubr.msk.f32.mxu0 %vm43_vm1, %v1799_v44 }
 0xedf   :  { %4436 = vmatmul.mubr.msk.f32.vlgmr.msra.gmra.mxu0 %vm43_vm1, %v4432_v43  ;;  %v4442_v45 = vpop.f32.mrf.mxu1 }
 0xee0   :  { %4447 = vmatprep.mubr.msk.f32.mxu0 %vm50_vm0, %v4817_v2  ;;  %v1972_v2 = vld [vmem:[#allocation3] sm:$0xff]  ;;  %4444 = vmatpush3.msra.mxu0 %v4135_v21 }
 0xee1   :  { %v1961_v48 = vpop.f32.mrf.mxu1  ;;  %4445 = vmatprep.subr.mxu0 %v4134_v22 }
 0xee2   :  { %4446 = vmatpush3.msra.mxu0 %v4134_v22 }
 0xee3   :  { %4448 = vmatmul.mubr.msk.f32.vlgmr.msra.gmra.mxu0 %vm50_vm0, %v4828_v4  ;;  %4457 = vmatprep.subr.mxu0 %v4848_v8 }
 0xee4   :  { %4458 = vmatpush3.msra.mxu0 %v4848_v8 }
 0xf9f   :  { %v4437_v46 = vpop.f32.mrf.mxu0 }
 0xfa0   :  { %v1967_v47 = vadd.f32 %v4442_v45, %v4437_v46 }
 0xfa1   :  { %v1880_v49 = vpop.f32.mrf.mxu0 }
 0xfa2   :  { %v1971_v50 = vadd.f32 %v4865_v16, %v1967_v47  ;;  %v1962_v51 = vadd.f32 %v1961_v48, %v1880_v49 }
 0xfa3   :  { %v4449_v32 = vpop.f32.mrf.mxu0 }
 0xfa4   :  { %4625 = vtanh.f32 %v1971_v50  ;;  %v1970_v52 = vadd.f32 %v4865_v16, %v1962_v51  ;;  %v1975_v56 = vsub.f32 0.0, %v1971_v50 }
 0xfa5   :  { %v2119_v33 = vpop.f32.mrf.mxu0 }
 0xfa6   :  { %4627 = vtanh.f32 %v1970_v52  ;;  %v1974_v57 = vsub.f32 0.0, %v1970_v52  ;;  %v1978_v58 = vmul.f32 1.442695, %v1975_v56 }
 0xfa8   :  { %v1976_v59 = vmul.f32 1.442695, %v1974_v57  ;;  %4629 = vpow2.f32 %v1978_v58 }
 0xfaa   :  { %4631 = vpow2.f32 %v1976_v59 }
 0xfb1   :  { %v4626_v53 = vpop.eup %4625 }
 0xfb2   :  { %2002 = vrot.lane.b32.xlu0 %v4626_v53, %s4745_s30 }
 0xfb3   :  { %v4628_v54 = vpop.eup %4627 }
 0xfb4   :  { %2000 = vrot.lane.b32.xlu1 %v4628_v54, %s4745_s30 }
 0xfb5   :  { %v4630_v60 = vpop.eup %4629 }
 0xfb6   :  { %1992 = vrot.lane.b32.xlu0 %v1973_v55, %s4744_s29  ;;  %v1981_v62 = vadd.f32 1.0, %v4630_v60 }
 0xfb7   :  { %v4632_v61 = vpop.eup %4631 }
 0xfb8   :  { %1990 = vrot.lane.b32.xlu1 %v1972_v2, %s4744_s29  ;;  %v1980_v63 = vadd.f32 1.0, %v4632_v61  ;;  %4633 = vrcp.f32 %v1981_v62 }
 0xfba   :  { %4635 = vrcp.f32 %v1980_v63 }
 0xfc5   :  { %v4634_v0 = vpop.eup %4633 }
 0xfc7   :  { %v4636_v5 = vpop.eup %4635 }
0x1024   :  { %v2003_v1 = vpop.permute.xlu0 %2002 }
0x1025   :  { %v2007_v3 = vmul.f32 %v4634_v0, %v2003_v1 }
0x1026   :  { %v2001_v6 = vpop.permute.xlu1 %2000 }
0x1027   :  { %v2006_v9 = vmul.f32 %v4636_v5, %v2001_v6  ;;  %2012 = vrot.lane.b32.xlu0 %v2007_v3, %s4744_s29 }
0x1028   :  { %v1993_v10 = vpop.permute.xlu0 %1992 }
0x1029   :  { %2010 = vrot.lane.b32.xlu1 %v2006_v9, %s4744_s29  ;;  %v1997_v12 = vmul.f32 %v4634_v0, %v1993_v10 }
0x102a   :  { %v1991_v11 = vpop.permute.xlu1 %1990 }
0x102b   :  { %v1996_v14 = vmul.f32 %v4636_v5, %v1991_v11 }
0x1099   :  { %v2013_v13 = vpop.permute.xlu0 %2012 }
0x109a   :  { %v2017_v15 = vadd.f32 %v2013_v13, %v1997_v12 }
0x109b   :  { %v2011_v17 = vpop.permute.xlu1 %2010 }
0x109c   :  { %4637 = vtanh.f32 %v2017_v15  ;;  %v2016_v18 = vadd.f32 %v2011_v17, %v1996_v14 }
0x109e   :  { %4639 = vtanh.f32 %v2016_v18 }
0x10a9   :  { %v4638_v19 = vpop.eup %4637 }
0x10aa   :  { %2024 = vrot.lane.b32.xlu0 %v4638_v19, %s4744_s29 }
0x10ab   :  { %v4640_v20 = vpop.eup %4639 }
0x10ac   :  { %2022 = vrot.lane.b32.xlu1 %v4640_v20, %s4744_s29 }
0x111c   :  { %v2025_v23 = vpop.permute.xlu0 %2024 }
0x111d   :  { %v2029_v24 = vmul.f32 %v4634_v0, %v2025_v23  ;;  %v2602_v23 = vld [vmem:[%s5318_s6] sm:$0xff] }
0x111e   :  { %v2023_v25 = vpop.permute.xlu1 %2022 }
0x111f   :  { %v2028_v26 = vmul.f32 %v4636_v5, %v2023_v25  ;;  %2034 = vrot.lane.b32.xlu0 %v2029_v24, %s4746_s15  ;;  %v2601_v24 = vld [vmem:[%s5319_s5] sm:$0xff] }
0x1120   :  { %v2798_v25 = vld [vmem:[%s5320_s8] sm:$0xff] }
0x1121   :  { %2032 = vrot.lane.b32.xlu1 %v2028_v26, %s4746_s15 }
0x1123   :  { %2044 = vrot.lane.b32.xlu0 %v2017_v15, %s4747_s16 }
0x1125   :  { %2042 = vrot.lane.b32.xlu1 %v2016_v18, %s4747_s16  ;;  %v5099_v18 = vld [vmem:[%s5314_s1 + $0x8] sm:$0xff] }
0x1191   :  { %v2035_v27 = vpop.permute.xlu0 %2034 }
0x1192   :  { %2039 = vst.msk [vmem:[#allocation2 + $0x8] sm:$0xff] %vm43_vm1, %v2035_v27 }
0x1193   :  { %v2033_v28 = vpop.permute.xlu1 %2032 }
0x1194   :  { %2038 = vst.msk [vmem:[#allocation2] sm:$0xff] %vm43_vm1, %v2033_v28 }
0x1195   :  { %v2045_v29 = vpop.permute.xlu0 %2044 }
0x1196   :  { %2049 = vst.msk [vmem:[#allocation3 + $0x8] sm:$0xff] %vm43_vm1, %v2045_v29 }
0x1197   :  { %v2043_v8 = vpop.permute.xlu1 %2042 }
0x1198   :  { %2048 = vst.msk [vmem:[#allocation3] sm:$0xff] %vm43_vm1, %v2043_v8 }
0x1199   :  { %v2129_v30 = vld [vmem:[#allocation2 + $0x8] sm:$0xff] }
0x119a   :  { %4450 = vmatprep.subr.mxu1 %v2129_v30 }
0x119b   :  { %4451 = vmatpush3.msra.mxu1 %v2129_v30  ;;  %v2128_v31 = vld [vmem:[#allocation2] sm:$0xff] }
0x119c   :  { %4452 = vmatprep.subr.mxu1 %v2128_v31 }
0x119d   :  { %4453 = vmatpush3.msra.mxu1 %v2128_v31  ;;  %v2370_v45 = vld [vmem:[#allocation3 + $0x8] sm:$0xff]  ;;  %v4153_v31 = vld [vmem:[%s5321_s7] ss:$0 sm:$0xff] }
0x119e   :  { %4455 = vmatmul.mubr.msk.f32.vlgmr.msra.gmra.mxu1 %vm50_vm0, %v4828_v4  ;;  %4462 = vmatprep.subr.msk.mxu1 %vm297_vm2, %v4839_v7 }
0x119f   :  { %4463 = vmatpush3.msk.msra.mxu1 %vm297_vm2, %v4839_v7  ;;  %4464 = vmatprep.mubr.msk.f32.mxu1 %vm290_vm3, %v2119_v33  ;;  %v2369_v46 = vld [vmem:[#allocation3] sm:$0xff] }
0x11a2   :  { %4465 = vmatmul.mubr.msk.f32.vlgmr.msra.gmra.mxu1 %vm290_vm3, %v4449_v32 }
0x11a3   :  { %4478 = vmatprep.mubr.msk.f32.mxu1 %vm50_vm0, %v5072_v34 }
0x125e   :  { %v4456_v4 = vpop.f32.mrf.mxu1 }
0x1260   :  { %v2196_v35 = vpop.f32.mrf.mxu1 }
0x1261   :  { %4459 = vmatprep.mubr.msk.f32.mxu0 %vm43_vm1, %v2196_v35 }
0x1262   :  { %4460 = vmatmul.mubr.msk.f32.vlgmr.msra.gmra.mxu0 %vm43_vm1, %v4456_v4  ;;  %v4466_v7 = vpop.f32.mrf.mxu1 }
0x1263   :  { %4471 = vmatprep.mubr.msk.f32.mxu0 %vm50_vm0, %v5072_v34 }
0x1264   :  { %v2358_v38 = vpop.f32.mrf.mxu1 }
0x1322   :  { %v4461_v36 = vpop.f32.mrf.mxu0 }
0x1323   :  { %v2364_v37 = vadd.f32 %v4466_v7, %v4461_v36 }
0x1324   :  { %v2277_v39 = vpop.f32.mrf.mxu0 }
0x1325   :  { %v2368_v40 = vadd.f32 %v4865_v16, %v2364_v37  ;;  %v2359_v41 = vadd.f32 %v2358_v38, %v2277_v39 }
0x1327   :  { %4641 = vtanh.f32 %v2368_v40  ;;  %v2367_v42 = vadd.f32 %v4865_v16, %v2359_v41  ;;  %v2372_v47 = vsub.f32 0.0, %v2368_v40 }
0x1329   :  { %4643 = vtanh.f32 %v2367_v42  ;;  %v2371_v48 = vsub.f32 0.0, %v2367_v42  ;;  %v2375_v49 = vmul.f32 1.442695, %v2372_v47 }
0x132b   :  { %v2373_v50 = vmul.f32 1.442695, %v2371_v48  ;;  %4645 = vpow2.f32 %v2375_v49  ;;  %v5138_v49 = vld [vmem:[%s5322_s9] sm:$0xff] }
0x132d   :  { %4647 = vpow2.f32 %v2373_v50 }
0x1334   :  { %v4642_v43 = vpop.eup %4641 }
0x1335   :  { %2399 = vrot.lane.b32.xlu0 %v4642_v43, %s4745_s30 }
0x1336   :  { %v4644_v44 = vpop.eup %4643 }
0x1337   :  { %2397 = vrot.lane.b32.xlu1 %v4644_v44, %s4745_s30 }
0x1338   :  { %v4646_v16 = vpop.eup %4645 }
0x1339   :  { %2389 = vrot.lane.b32.xlu0 %v2370_v45, %s4744_s29  ;;  %v2378_v52 = vadd.f32 1.0, %v4646_v16 }
0x133a   :  { %v4648_v51 = vpop.eup %4647 }
0x133b   :  { %2387 = vrot.lane.b32.xlu1 %v2369_v46, %s4744_s29  ;;  %v2377_v53 = vadd.f32 1.0, %v4648_v51  ;;  %4649 = vrcp.f32 %v2378_v52 }
0x133d   :  { %4651 = vrcp.f32 %v2377_v53 }
0x1348   :  { %v4650_v54 = vpop.eup %4649 }
0x134a   :  { %v4652_v56 = vpop.eup %4651 }
0x13a7   :  { %v2400_v55 = vpop.permute.xlu0 %2399 }
0x13a8   :  { %v2404_v2 = vmul.f32 %v4650_v54, %v2400_v55 }
0x13a9   :  { %v2398_v57 = vpop.permute.xlu1 %2397 }
0x13aa   :  { %v2403_v58 = vmul.f32 %v4652_v56, %v2398_v57  ;;  %2409 = vrot.lane.b32.xlu0 %v2404_v2, %s4744_s29 }
0x13ab   :  { %v2390_v59 = vpop.permute.xlu0 %2389 }
0x13ac   :  { %2407 = vrot.lane.b32.xlu1 %v2403_v58, %s4744_s29  ;;  %v2394_v61 = vmul.f32 %v4650_v54, %v2390_v59 }
0x13ad   :  { %v2388_v60 = vpop.permute.xlu1 %2387 }
0x13ae   :  { %v2393_v63 = vmul.f32 %v4652_v56, %v2388_v60 }
0x141c   :  { %v2410_v62 = vpop.permute.xlu0 %2409 }
0x141d   :  { %v2414_v0 = vadd.f32 %v2410_v62, %v2394_v61 }
0x141e   :  { %v2408_v1 = vpop.permute.xlu1 %2407 }
0x141f   :  { %4653 = vtanh.f32 %v2414_v0  ;;  %v2413_v3 = vadd.f32 %v2408_v1, %v2393_v63 }
0x1421   :  { %4655 = vtanh.f32 %v2413_v3 }
0x142c   :  { %v4654_v5 = vpop.eup %4653 }
0x142d   :  { %2421 = vrot.lane.b32.xlu0 %v4654_v5, %s4744_s29 }
0x142e   :  { %v4656_v6 = vpop.eup %4655 }
0x142f   :  { %2419 = vrot.lane.b32.xlu1 %v4656_v6, %s4744_s29 }
0x1433   :  { %2441 = vrot.lane.b32.xlu1 %v2414_v0, %s4747_s16 }
0x1437   :  { %2439 = vrot.lane.b32.xlu1 %v2413_v3, %s4747_s16 }
0x149f   :  { %v2422_v9 = vpop.permute.xlu0 %2421 }
0x14a0   :  { %v2426_v10 = vmul.f32 %v4650_v54, %v2422_v9  ;;  %v4156_v54 = vld [vmem:[%s5323_s10] ss:$0 sm:$0xff] }
0x14a1   :  { %v2420_v11 = vpop.permute.xlu1 %2419 }
0x14a2   :  { %2431 = vrot.lane.b32.xlu0 %v2426_v10, %s4746_s15  ;;  %v2425_v12 = vmul.f32 %v4652_v56, %v2420_v11 }
0x14a5   :  { %v2442_v13 = vpop.permute.xlu1 %2441 }
0x14a6   :  { %2446 = vst.msk [vmem:[#allocation3 + $0x8] sm:$0xff] %vm43_vm1, %v2442_v13  ;;  %2429 = vrot.lane.b32.xlu0 %v2425_v12, %s4746_s15 }
0x14a9   :  { %v2440_v14 = vpop.permute.xlu1 %2439 }
0x14aa   :  { %2445 = vst.msk [vmem:[#allocation3] sm:$0xff] %vm43_vm1, %v2440_v14 }
0x14ad   :  { %v2525_v15 = vld [vmem:[#allocation3 + $0x8] sm:$0xff] }
0x14ae   :  { %4474 = vmatprep.subr.mxu1 %v2525_v15 }
0x14af   :  { %4475 = vmatpush3.msra.mxu1 %v2525_v15 }
0x14b1   :  { %v2524_v17 = vld [vmem:[#allocation3] sm:$0xff] }
0x14b2   :  { %4476 = vmatprep.subr.mxu1 %v2524_v17 }
0x14b3   :  { %4477 = vmatpush3.msra.mxu1 %v2524_v17 }
0x14b4   :  { %4479 = vmatmul.mubr.msk.f32.vlgmr.msra.gmra.mxu1 %vm50_vm0, %v5099_v18  ;;  %4486 = vmatprep.subr.mxu1 %v2601_v24 }
0x14b5   :  { %4487 = vmatpush3.msra.mxu1 %v2601_v24 }
0x1514   :  { %v2432_v19 = vpop.permute.xlu0 %2431 }
0x1515   :  { %2436 = vst.msk [vmem:[#allocation2 + $0x8] sm:$0xff] %vm43_vm1, %v2432_v19 }
0x1518   :  { %v2430_v20 = vpop.permute.xlu0 %2429 }
0x1519   :  { %2435 = vst.msk [vmem:[#allocation2] sm:$0xff] %vm43_vm1, %v2430_v20 }
0x151c   :  { %v2448_v21 = vld [vmem:[#allocation2 + $0x8] sm:$0xff] }
0x151d   :  { %4467 = vmatprep.subr.mxu0 %v2448_v21 }
0x151e   :  { %4468 = vmatpush3.msra.mxu0 %v2448_v21 }
0x1520   :  { %v2447_v22 = vld [vmem:[#allocation2] sm:$0xff] }
0x1521   :  { %4469 = vmatprep.subr.mxu0 %v2447_v22 }
0x1522   :  { %4470 = vmatpush3.msra.mxu0 %v2447_v22 }
0x1523   :  { %4472 = vmatmul.mubr.msk.f32.vlgmr.msra.gmra.mxu0 %vm50_vm0, %v5099_v18  ;;  %4481 = vmatprep.subr.mxu0 %v2602_v23 }
0x1524   :  { %4482 = vmatpush3.msra.mxu0 %v2602_v23 }
0x1525   :  { %4491 = vmatprep.subr.mxu0 %v2798_v25 }
0x1574   :  { %v4480_v26 = vpop.f32.mrf.mxu1 }
0x1576   :  { %v2592_v27 = vpop.f32.mrf.mxu1 }
0x1577   :  { %4483 = vmatprep.mubr.msk.f32.mxu0 %vm43_vm1, %v2592_v27 }
0x1578   :  { %4484 = vmatmul.mubr.msk.f32.vlgmr.msra.gmra.mxu0 %vm43_vm1, %v4480_v26 }
0x1579   :  { %4492 = vmatpush3.msra.mxu0 %v2798_v25 }
0x157a   :  { %4503 = vmatprep.subr.mxu0 %v5138_v49 }
0x15e3   :  { %v4473_v28 = vpop.f32.mrf.mxu0 }
0x15e5   :  { %v2515_v29 = vpop.f32.mrf.mxu0 }
0x15e6   :  { %4488 = vmatprep.mubr.msk.f32.mxu1 %vm43_vm1, %v2515_v29  ;;  %4493 = vmatprep.mubr.msk.f32.mxu0 %vm43_vm1, %v2515_v29 }
0x15e7   :  { %4489 = vmatmul.mubr.msk.f32.vlgmr.msra.gmra.mxu1 %vm43_vm1, %v4473_v28  ;;  %4494 = vmatmul.mubr.msk.f32.vlgmr.msra.gmra.mxu0 %vm43_vm1, %v4473_v28 }
0x15e8   :  { %4500 = vmatprep.mubr.msk.f32.mxu1 %vm50_vm0, %v5072_v34  ;;  %4504 = vmatpush3.msra.mxu0 %v5138_v49 }
0x15e9   :  { %4515 = vmatprep.subr.mxu0 %v5138_v49 }
0x1638   :  { %v4485_v8 = vpop.f32.mrf.mxu0 }
0x163a   :  { %v2675_v33 = vpop.f32.mrf.mxu0 }
0x16a7   :  { %v4490_v30 = vpop.f32.mrf.mxu1  ;;  %v4495_v53 = vpop.f32.mrf.mxu0 }
0x16a8   :  { %v2762_v32 = vadd.f32 %v4490_v30, %v4485_v8  ;;  %v5152_v2 = vadd.f32 %v4495_v53, %v4156_v54 }
0x16a9   :  { %v2756_v4 = vpop.f32.mrf.mxu1  ;;  %v2872_v55 = vpop.f32.mrf.mxu0 }
0x16aa   :  { %v2773_v35 = vadd.f32 %v4153_v31, %v2762_v32  ;;  %v2757_v7 = vadd.f32 %v2756_v4, %v2675_v33  ;;  %v5154_v57 = vadd.f32 %v4156_v54, %v2872_v55 }
0x16ac   :  { %v2777_v36 = vmin.f32 %v2773_v35, 0.0  ;;  %v2772_v37 = vadd.f32 %v4153_v31, %v2757_v7  ;;  %vm2775_vm4 = vcmp.gt.f32.partialorder %v2773_v35, 0.0 }
0x16ae   :  { %v2780_v38 = vmul.f32 1.442695, %v2777_v36  ;;  %v2776_v39 = vmin.f32 %v2772_v37, 0.0  ;;  %vm2774_vm5 = vcmp.gt.f32.partialorder %v2772_v37, 0.0 }
0x16b0   :  { %4657 = vpow2.f32 %v2780_v38  ;;  %v2778_v40 = vmul.f32 1.442695, %v2776_v39 }
0x16b2   :  { %4659 = vpow2.f32 %v2778_v40 }
0x16bd   :  { %v4658_v41 = vpop.eup %4657 }
0x16be   :  { %v4155_v42 = vadd.f32 -1.0, %v4658_v41 }
0x16bf   :  { %v4660_v43 = vpop.eup %4659 }
0x16c0   :  { %v2785_v44 = vsel %vm2775_vm4, %v2773_v35, %v4155_v42  ;;  %v4154_v45 = vadd.f32 -1.0, %v4660_v43 }
0x16c1   :  { %2792 = vrot.lane.b32.xlu0 %v2785_v44, %s4747_s16  ;;  %2787 = vst.msk [vmem:[#allocation4 + $0x8] sm:$0xff] %vm43_vm1, %v2785_v44 }
0x16c2   :  { %v2784_v46 = vsel %vm2774_vm5, %v2772_v37, %v4154_v45 }
0x16c3   :  { %2790 = vrot.lane.b32.xlu1 %v2784_v46, %s4747_s16  ;;  %2786 = vst.msk [vmem:[#allocation4] sm:$0xff] %vm43_vm1, %v2784_v46 }
0x16c8   :  { %v2883_v47 = vld [vmem:[#allocation4 + $0x8] sm:$0xff] }
0x16c9   :  { %4496 = vmatprep.subr.mxu1 %v2883_v47 }
0x16ca   :  { %4497 = vmatpush3.msra.mxu1 %v2883_v47  ;;  %v2882_v48 = vld [vmem:[#allocation4] sm:$0xff] }
0x16cb   :  { %4498 = vmatprep.subr.mxu1 %v2882_v48 }
0x16cc   :  { %4499 = vmatpush3.msra.mxu1 %v2882_v48 }
0x16cd   :  { %4501 = vmatmul.mubr.msk.f32.vlgmr.msra.gmra.mxu1 %vm50_vm0, %v5099_v18 }
0x16ce   :  { %4512 = vmatprep.mubr.msk.f32.mxu1 %vm50_vm0, %v5072_v34 }
0x1733   :  { %v2793_v50 = vpop.permute.xlu0 %2792 }
0x1734   :  { %2797 = vst.msk [vmem:[#allocation5 + $0x8] sm:$0xff] %vm43_vm1, %v2793_v50 }
0x1735   :  { %v2791_v16 = vpop.permute.xlu1 %2790 }
0x1736   :  { %2796 = vst.msk [vmem:[#allocation5] sm:$0xff] %vm43_vm1, %v2791_v16 }
0x173b   :  { %v3041_v63 = vld [vmem:[#allocation5 + $0x8] sm:$0xff] }
0x173d   :  { %v3040_v0 = vld [vmem:[#allocation5] sm:$0xff] }
0x178d   :  { %v4502_v51 = vpop.f32.mrf.mxu1 }
0x178f   :  { %v2950_v52 = vpop.f32.mrf.mxu1 }
0x1790   :  { %4505 = vmatprep.mubr.msk.f32.mxu0 %vm43_vm1, %v2950_v52 }
0x1791   :  { %4506 = vmatmul.mubr.msk.f32.vlgmr.msra.gmra.mxu0 %vm43_vm1, %v4502_v51 }
0x1792   :  { %4516 = vmatpush3.msra.mxu0 %v5138_v49 }
0x1793   :  { %4527 = vmatprep.subr.mxu0 %v5138_v49 }
0x1851   :  { %v4507_v56 = vpop.f32.mrf.mxu0 }
0x1852   :  { %v3037_v58 = vadd.f32 %v4507_v56, %v5152_v2 }
0x1853   :  { %v3031_v59 = vpop.f32.mrf.mxu0 }
0x1854   :  { %4661 = vtanh.f32 %v3037_v58  ;;  %v3032_v60 = vadd.f32 %v3031_v59, %v5154_v57  ;;  %v3043_v1 = vsub.f32 0.0, %v3037_v58 }
0x1856   :  { %4663 = vtanh.f32 %v3032_v60  ;;  %v3042_v3 = vsub.f32 0.0, %v3032_v60  ;;  %v3046_v5 = vmul.f32 1.442695, %v3043_v1 }
0x1858   :  { %v3044_v6 = vmul.f32 1.442695, %v3042_v3  ;;  %4665 = vpow2.f32 %v3046_v5 }
0x185a   :  { %4667 = vpow2.f32 %v3044_v6 }
0x1861   :  { %v4662_v61 = vpop.eup %4661 }
0x1862   :  { %3070 = vrot.lane.b32.xlu0 %v4662_v61, %s4745_s30 }
0x1863   :  { %v4664_v62 = vpop.eup %4663 }
0x1864   :  { %3068 = vrot.lane.b32.xlu1 %v4664_v62, %s4745_s30 }
0x1865   :  { %v4666_v9 = vpop.eup %4665 }
0x1866   :  { %3060 = vrot.lane.b32.xlu0 %v3041_v63, %s4744_s29  ;;  %v3049_v11 = vadd.f32 1.0, %v4666_v9 }
0x1867   :  { %v4668_v10 = vpop.eup %4667 }
0x1868   :  { %3058 = vrot.lane.b32.xlu1 %v3040_v0, %s4744_s29  ;;  %v3048_v12 = vadd.f32 1.0, %v4668_v10  ;;  %4669 = vrcp.f32 %v3049_v11 }
0x186a   :  { %4671 = vrcp.f32 %v3048_v12 }
0x1875   :  { %v4670_v13 = vpop.eup %4669 }
0x1877   :  { %v4672_v17 = vpop.eup %4671 }
0x18d4   :  { %v3071_v14 = vpop.permute.xlu0 %3070 }
0x18d5   :  { %v3075_v15 = vmul.f32 %v4670_v13, %v3071_v14 }
0x18d6   :  { %v3069_v19 = vpop.permute.xlu1 %3068 }
0x18d7   :  { %v3074_v20 = vmul.f32 %v4672_v17, %v3069_v19  ;;  %3080 = vrot.lane.b32.xlu0 %v3075_v15, %s4744_s29 }
0x18d8   :  { %v3061_v21 = vpop.permute.xlu0 %3060 }
0x18d9   :  { %3078 = vrot.lane.b32.xlu1 %v3074_v20, %s4744_s29  ;;  %v3065_v23 = vmul.f32 %v4670_v13, %v3061_v21 }
0x18da   :  { %v3059_v22 = vpop.permute.xlu1 %3058 }
0x18db   :  { %v3064_v25 = vmul.f32 %v4672_v17, %v3059_v22 }
0x1949   :  { %v3081_v24 = vpop.permute.xlu0 %3080 }
0x194a   :  { %v3085_v26 = vadd.f32 %v3081_v24, %v3065_v23 }
0x194b   :  { %v3079_v27 = vpop.permute.xlu1 %3078 }
0x194c   :  { %4673 = vtanh.f32 %v3085_v26  ;;  %v3084_v28 = vadd.f32 %v3079_v27, %v3064_v25 }
0x194e   :  { %4675 = vtanh.f32 %v3084_v28 }
0x1959   :  { %v4674_v29 = vpop.eup %4673 }
0x195a   :  { %3092 = vrot.lane.b32.xlu0 %v4674_v29, %s4744_s29 }
0x195b   :  { %v4676_v8 = vpop.eup %4675 }
0x195c   :  { %3090 = vrot.lane.b32.xlu1 %v4676_v8, %s4744_s29 }
0x19cc   :  { %v3093_v30 = vpop.permute.xlu0 %3092 }
0x19cd   :  { %v3097_v31 = vmul.f32 %v4670_v13, %v3093_v30 }
0x19ce   :  { %v3091_v32 = vpop.permute.xlu1 %3090 }
0x19cf   :  { %v3096_v33 = vmul.f32 %v4672_v17, %v3091_v32  ;;  %3102 = vrot.lane.b32.xlu0 %v3097_v31, %s4746_s15 }
0x19d1   :  { %3100 = vrot.lane.b32.xlu1 %v3096_v33, %s4746_s15 }
0x19d3   :  { %3112 = vrot.lane.b32.xlu0 %v3085_v26, %s4747_s16 }
0x19d5   :  { %3110 = vrot.lane.b32.xlu1 %v3084_v28, %s4747_s16 }
0x1a41   :  { %v3103_v4 = vpop.permute.xlu0 %3102 }
0x1a42   :  { %3107 = vst.msk [vmem:[#allocation4 + $0x8] sm:$0xff] %vm43_vm1, %v3103_v4  ;;  %3119 = vst.msk [vmem:[%s5324_s11 + $0x8] sm:$0xff] %vm43_vm1, %v3103_v4 }
0x1a43   :  { %v3101_v35 = vpop.permute.xlu1 %3100 }
0x1a44   :  { %3106 = vst.msk [vmem:[#allocation4] sm:$0xff] %vm43_vm1, %v3101_v35  ;;  %3118 = vst.msk [vmem:[%s5324_s11] sm:$0xff] %vm43_vm1, %v3101_v35 }
0x1a45   :  { %v3113_v7 = vpop.permute.xlu0 %3112 }
0x1a46   :  { %3117 = vst.msk [vmem:[#allocation5 + $0x8] sm:$0xff] %vm43_vm1, %v3113_v7 }
0x1a47   :  { %v3111_v36 = vpop.permute.xlu1 %3110 }
0x1a48   :  { %3116 = vst.msk [vmem:[#allocation5] sm:$0xff] %vm43_vm1, %v3111_v36 }
0x1a49   :  { %v3121_v37 = vld [vmem:[#allocation4 + $0x8] sm:$0xff] }
0x1a4a   :  { %4508 = vmatprep.subr.mxu1 %v3121_v37 }
0x1a4b   :  { %4509 = vmatpush3.msra.mxu1 %v3121_v37  ;;  %v3120_v38 = vld [vmem:[#allocation4] sm:$0xff] }
0x1a4c   :  { %4510 = vmatprep.subr.mxu1 %v3120_v38 }
0x1a4d   :  { %4511 = vmatpush3.msra.mxu1 %v3120_v38  ;;  %v3279_v47 = vld [vmem:[#allocation5 + $0x8] sm:$0xff] }
0x1a4e   :  { %4513 = vmatmul.mubr.msk.f32.vlgmr.msra.gmra.mxu1 %vm50_vm0, %v5099_v18 }
0x1a4f   :  { %4524 = vmatprep.mubr.msk.f32.mxu1 %vm50_vm0, %v5072_v34  ;;  %v3278_v48 = vld [vmem:[#allocation5] sm:$0xff] }
0x1b0e   :  { %v4514_v39 = vpop.f32.mrf.mxu1 }
0x1b10   :  { %v3188_v40 = vpop.f32.mrf.mxu1 }
0x1b11   :  { %4517 = vmatprep.mubr.msk.f32.mxu0 %vm43_vm1, %v3188_v40 }
0x1b12   :  { %4518 = vmatmul.mubr.msk.f32.vlgmr.msra.gmra.mxu0 %vm43_vm1, %v4514_v39 }
0x1b13   :  { %4528 = vmatpush3.msra.mxu0 %v5138_v49 }
0x1b14   :  { %4539 = vmatprep.subr.mxu0 %v5138_v49 }
0x1bd2   :  { %v4519_v41 = vpop.f32.mrf.mxu0 }
0x1bd3   :  { %v3275_v42 = vadd.f32 %v4519_v41, %v5152_v2 }
0x1bd4   :  { %v3269_v43 = vpop.f32.mrf.mxu0 }
0x1bd5   :  { %4677 = vtanh.f32 %v3275_v42  ;;  %v3270_v44 = vadd.f32 %v3269_v43, %v5154_v57  ;;  %v3281_v50 = vsub.f32 0.0, %v3275_v42 }
0x1bd7   :  { %4679 = vtanh.f32 %v3270_v44  ;;  %v3280_v16 = vsub.f32 0.0, %v3270_v44  ;;  %v3284_v51 = vmul.f32 1.442695, %v3281_v50 }
0x1bd9   :  { %v3282_v52 = vmul.f32 1.442695, %v3280_v16  ;;  %4681 = vpow2.f32 %v3284_v51 }
0x1bdb   :  { %4683 = vpow2.f32 %v3282_v52 }
0x1be2   :  { %v4678_v45 = vpop.eup %4677 }
0x1be3   :  { %3308 = vrot.lane.b32.xlu0 %v4678_v45, %s4745_s30 }
0x1be4   :  { %v4680_v46 = vpop.eup %4679 }
0x1be5   :  { %3306 = vrot.lane.b32.xlu1 %v4680_v46, %s4745_s30 }
0x1be6   :  { %v4682_v53 = vpop.eup %4681 }
0x1be7   :  { %3298 = vrot.lane.b32.xlu0 %v3279_v47, %s4744_s29  ;;  %v3287_v55 = vadd.f32 1.0, %v4682_v53 }
0x1be8   :  { %v4684_v54 = vpop.eup %4683 }
0x1be9   :  { %3296 = vrot.lane.b32.xlu1 %v3278_v48, %s4744_s29  ;;  %v3286_v56 = vadd.f32 1.0, %v4684_v54  ;;  %4685 = vrcp.f32 %v3287_v55 }
0x1beb   :  { %4687 = vrcp.f32 %v3286_v56 }
0x1bf6   :  { %v4686_v58 = vpop.eup %4685 }
0x1bf8   :  { %v4688_v61 = vpop.eup %4687 }
0x1c55   :  { %v3309_v59 = vpop.permute.xlu0 %3308 }
0x1c56   :  { %v3313_v60 = vmul.f32 %v4686_v58, %v3309_v59 }
0x1c57   :  { %v3307_v62 = vpop.permute.xlu1 %3306 }
0x1c58   :  { %v3312_v63 = vmul.f32 %v4688_v61, %v3307_v62  ;;  %3318 = vrot.lane.b32.xlu0 %v3313_v60, %s4744_s29 }
0x1c59   :  { %v3299_v0 = vpop.permute.xlu0 %3298 }
0x1c5a   :  { %3316 = vrot.lane.b32.xlu1 %v3312_v63, %s4744_s29  ;;  %v3303_v3 = vmul.f32 %v4686_v58, %v3299_v0 }
0x1c5b   :  { %v3297_v1 = vpop.permute.xlu1 %3296 }
0x1c5c   :  { %v3302_v6 = vmul.f32 %v4688_v61, %v3297_v1 }
0x1cca   :  { %v3319_v5 = vpop.permute.xlu0 %3318 }
0x1ccb   :  { %v3323_v9 = vadd.f32 %v3319_v5, %v3303_v3 }
0x1ccc   :  { %v3317_v10 = vpop.permute.xlu1 %3316 }
0x1ccd   :  { %4689 = vtanh.f32 %v3323_v9  ;;  %v3322_v11 = vadd.f32 %v3317_v10, %v3302_v6 }
0x1ccf   :  { %4691 = vtanh.f32 %v3322_v11 }
0x1cda   :  { %v4690_v12 = vpop.eup %4689 }
0x1cdb   :  { %3330 = vrot.lane.b32.xlu0 %v4690_v12, %s4744_s29 }
0x1cdc   :  { %v4692_v13 = vpop.eup %4691 }
0x1cdd   :  { %3328 = vrot.lane.b32.xlu1 %v4692_v13, %s4744_s29 }
0x1d4d   :  { %v3331_v14 = vpop.permute.xlu0 %3330 }
0x1d4e   :  { %v3335_v15 = vmul.f32 %v4686_v58, %v3331_v14 }
0x1d4f   :  { %v3329_v17 = vpop.permute.xlu1 %3328 }
0x1d50   :  { %v3334_v19 = vmul.f32 %v4688_v61, %v3329_v17  ;;  %3340 = vrot.lane.b32.xlu0 %v3335_v15, %s4746_s15 }
0x1d52   :  { %3338 = vrot.lane.b32.xlu1 %v3334_v19, %s4746_s15 }
0x1d54   :  { %3350 = vrot.lane.b32.xlu0 %v3323_v9, %s4747_s16 }
0x1d56   :  { %3348 = vrot.lane.b32.xlu1 %v3322_v11, %s4747_s16 }
0x1dc2   :  { %v3341_v20 = vpop.permute.xlu0 %3340 }
0x1dc3   :  { %3345 = vst.msk [vmem:[#allocation4 + $0x8] sm:$0xff] %vm43_vm1, %v3341_v20  ;;  %4168 = vst.msk [vmem:[%s5324_s11 + $0x18] sm:$0xff] %vm43_vm1, %v3341_v20 }
0x1dc4   :  { %v3339_v21 = vpop.permute.xlu1 %3338 }
0x1dc5   :  { %3344 = vst.msk [vmem:[#allocation4] sm:$0xff] %vm43_vm1, %v3339_v21  ;;  %4167 = vst.msk [vmem:[%s5324_s11 + $0x10] sm:$0xff] %vm43_vm1, %v3339_v21 }
0x1dc6   :  { %v3351_v22 = vpop.permute.xlu0 %3350 }
0x1dc7   :  { %3355 = vst.msk [vmem:[#allocation5 + $0x8] sm:$0xff] %vm43_vm1, %v3351_v22 }
0x1dc8   :  { %v3349_v23 = vpop.permute.xlu1 %3348 }
0x1dc9   :  { %3354 = vst.msk [vmem:[#allocation5] sm:$0xff] %vm43_vm1, %v3349_v23 }
0x1dca   :  { %v3360_v24 = vld [vmem:[#allocation4 + $0x8] sm:$0xff] }
0x1dcb   :  { %4520 = vmatprep.subr.mxu1 %v3360_v24 }
0x1dcc   :  { %4521 = vmatpush3.msra.mxu1 %v3360_v24  ;;  %v3359_v25 = vld [vmem:[#allocation4] sm:$0xff] }
0x1dcd   :  { %4522 = vmatprep.subr.mxu1 %v3359_v25 }
0x1dce   :  { %4523 = vmatpush3.msra.mxu1 %v3359_v25  ;;  %v3518_v33 = vld [vmem:[#allocation5 + $0x8] sm:$0xff] }
0x1dcf   :  { %4525 = vmatmul.mubr.msk.f32.vlgmr.msra.gmra.mxu1 %vm50_vm0, %v5099_v18 }
0x1dd0   :  { %4536 = vmatprep.mubr.msk.f32.mxu1 %vm50_vm0, %v5072_v34  ;;  %v3517_v4 = vld [vmem:[#allocation5] sm:$0xff] }
0x1e8f   :  { %v4526_v26 = vpop.f32.mrf.mxu1 }
0x1e91   :  { %v3427_v27 = vpop.f32.mrf.mxu1 }
0x1e92   :  { %4529 = vmatprep.mubr.msk.f32.mxu0 %vm43_vm1, %v3427_v27 }
0x1e93   :  { %4530 = vmatmul.mubr.msk.f32.vlgmr.msra.gmra.mxu0 %vm43_vm1, %v4526_v26 }
0x1e94   :  { %4540 = vmatpush3.msra.mxu0 %v5138_v49 }
0x1e95   :  { %4551 = vmatprep.subr.mxu0 %v5138_v49 }
0x1f53   :  { %v4531_v28 = vpop.f32.mrf.mxu0 }
0x1f54   :  { %v3514_v29 = vadd.f32 %v4531_v28, %v5152_v2 }
0x1f55   :  { %v3508_v8 = vpop.f32.mrf.mxu0 }
0x1f56   :  { %4693 = vtanh.f32 %v3514_v29  ;;  %v3509_v30 = vadd.f32 %v3508_v8, %v5154_v57  ;;  %v3520_v35 = vsub.f32 0.0, %v3514_v29 }
0x1f58   :  { %4695 = vtanh.f32 %v3509_v30  ;;  %v3519_v7 = vsub.f32 0.0, %v3509_v30  ;;  %v3523_v36 = vmul.f32 1.442695, %v3520_v35 }
0x1f5a   :  { %v3521_v37 = vmul.f32 1.442695, %v3519_v7  ;;  %4697 = vpow2.f32 %v3523_v36 }
0x1f5c   :  { %4699 = vpow2.f32 %v3521_v37 }
0x1f63   :  { %v4694_v31 = vpop.eup %4693 }
0x1f64   :  { %3547 = vrot.lane.b32.xlu0 %v4694_v31, %s4745_s30 }
0x1f65   :  { %v4696_v32 = vpop.eup %4695 }
0x1f66   :  { %3545 = vrot.lane.b32.xlu1 %v4696_v32, %s4745_s30 }
0x1f67   :  { %v4698_v38 = vpop.eup %4697 }
0x1f68   :  { %3537 = vrot.lane.b32.xlu0 %v3518_v33, %s4744_s29  ;;  %v3526_v40 = vadd.f32 1.0, %v4698_v38 }
0x1f69   :  { %v4700_v39 = vpop.eup %4699 }
0x1f6a   :  { %3535 = vrot.lane.b32.xlu1 %v3517_v4, %s4744_s29  ;;  %v3525_v41 = vadd.f32 1.0, %v4700_v39  ;;  %4701 = vrcp.f32 %v3526_v40 }
0x1f6c   :  { %4703 = vrcp.f32 %v3525_v41 }
0x1f77   :  { %v4702_v42 = vpop.eup %4701 }
0x1f79   :  { %v4704_v45 = vpop.eup %4703 }
0x1fd6   :  { %v3548_v43 = vpop.permute.xlu0 %3547 }
0x1fd7   :  { %v3552_v44 = vmul.f32 %v4702_v42, %v3548_v43 }
0x1fd8   :  { %v3546_v46 = vpop.permute.xlu1 %3545 }
0x1fd9   :  { %v3551_v47 = vmul.f32 %v4704_v45, %v3546_v46  ;;  %3557 = vrot.lane.b32.xlu0 %v3552_v44, %s4744_s29 }
0x1fda   :  { %v3538_v48 = vpop.permute.xlu0 %3537 }
0x1fdb   :  { %3555 = vrot.lane.b32.xlu1 %v3551_v47, %s4744_s29  ;;  %v3542_v16 = vmul.f32 %v4702_v42, %v3538_v48 }
0x1fdc   :  { %v3536_v50 = vpop.permute.xlu1 %3535 }
0x1fdd   :  { %v3541_v52 = vmul.f32 %v4704_v45, %v3536_v50 }
0x204b   :  { %v3558_v51 = vpop.permute.xlu0 %3557 }
0x204c   :  { %v3562_v53 = vadd.f32 %v3558_v51, %v3542_v16 }
0x204d   :  { %v3556_v54 = vpop.permute.xlu1 %3555 }
0x204e   :  { %4705 = vtanh.f32 %v3562_v53  ;;  %v3561_v55 = vadd.f32 %v3556_v54, %v3541_v52 }
0x2050   :  { %4707 = vtanh.f32 %v3561_v55 }
0x205b   :  { %v4706_v56 = vpop.eup %4705 }
0x205c   :  { %3569 = vrot.lane.b32.xlu0 %v4706_v56, %s4744_s29 }
0x205d   :  { %v4708_v58 = vpop.eup %4707 }
0x205e   :  { %3567 = vrot.lane.b32.xlu1 %v4708_v58, %s4744_s29 }
0x20ce   :  { %v3570_v59 = vpop.permute.xlu0 %3569 }
0x20cf   :  { %v3574_v60 = vmul.f32 %v4702_v42, %v3570_v59 }
0x20d0   :  { %v3568_v61 = vpop.permute.xlu1 %3567 }
0x20d1   :  { %v3573_v62 = vmul.f32 %v4704_v45, %v3568_v61  ;;  %3579 = vrot.lane.b32.xlu0 %v3574_v60, %s4746_s15 }
0x20d3   :  { %3577 = vrot.lane.b32.xlu1 %v3573_v62, %s4746_s15 }
0x20d5   :  { %3589 = vrot.lane.b32.xlu0 %v3562_v53, %s4747_s16 }
0x20d7   :  { %3587 = vrot.lane.b32.xlu1 %v3561_v55, %s4747_s16 }
0x2143   :  { %v3580_v63 = vpop.permute.xlu0 %3579 }
0x2144   :  { %3584 = vst.msk [vmem:[#allocation4 + $0x8] sm:$0xff] %vm43_vm1, %v3580_v63  ;;  %4174 = vst.msk [vmem:[%s5324_s11 + $0x28] sm:$0xff] %vm43_vm1, %v3580_v63 }
0x2145   :  { %v3578_v0 = vpop.permute.xlu1 %3577 }
0x2146   :  { %3583 = vst.msk [vmem:[#allocation4] sm:$0xff] %vm43_vm1, %v3578_v0  ;;  %4173 = vst.msk [vmem:[%s5324_s11 + $0x20] sm:$0xff] %vm43_vm1, %v3578_v0 }
0x2147   :  { %v3590_v1 = vpop.permute.xlu0 %3589 }
0x2148   :  { %3594 = vst.msk [vmem:[#allocation5 + $0x8] sm:$0xff] %vm43_vm1, %v3590_v1 }
0x2149   :  { %v3588_v3 = vpop.permute.xlu1 %3587 }
0x214a   :  { %3593 = vst.msk [vmem:[#allocation5] sm:$0xff] %vm43_vm1, %v3588_v3 }
0x214b   :  { %v3599_v5 = vld [vmem:[#allocation4 + $0x8] sm:$0xff] }
0x214c   :  { %4532 = vmatprep.subr.mxu1 %v3599_v5 }
0x214d   :  { %4533 = vmatpush3.msra.mxu1 %v3599_v5  ;;  %v3598_v6 = vld [vmem:[#allocation4] sm:$0xff] }
0x214e   :  { %4534 = vmatprep.subr.mxu1 %v3598_v6 }
0x214f   :  { %4535 = vmatpush3.msra.mxu1 %v3598_v6  ;;  %v3757_v17 = vld [vmem:[#allocation5 + $0x8] sm:$0xff] }
0x2150   :  { %4537 = vmatmul.mubr.msk.f32.vlgmr.msra.gmra.mxu1 %vm50_vm0, %v5099_v18 }
0x2151   :  { %4548 = vmatprep.mubr.msk.f32.mxu1 %vm50_vm0, %v5072_v34  ;;  %v3756_v19 = vld [vmem:[#allocation5] sm:$0xff] }
0x2210   :  { %v4538_v9 = vpop.f32.mrf.mxu1 }
0x2212   :  { %v3666_v10 = vpop.f32.mrf.mxu1 }
0x2213   :  { %4541 = vmatprep.mubr.msk.f32.mxu0 %vm43_vm1, %v3666_v10 }
0x2214   :  { %4542 = vmatmul.mubr.msk.f32.vlgmr.msra.gmra.mxu0 %vm43_vm1, %v4538_v9 }
0x2215   :  { %4552 = vmatpush3.msra.mxu0 %v5138_v49 }
0x22d4   :  { %v4543_v11 = vpop.f32.mrf.mxu0 }
0x22d5   :  { %v3753_v12 = vadd.f32 %v4543_v11, %v5152_v2 }
0x22d6   :  { %v3747_v13 = vpop.f32.mrf.mxu0 }
0x22d7   :  { %4709 = vtanh.f32 %v3753_v12  ;;  %v3748_v14 = vadd.f32 %v3747_v13, %v5154_v57  ;;  %v3759_v49 = vsub.f32 0.0, %v3753_v12 }
0x22d9   :  { %4711 = vtanh.f32 %v3748_v14  ;;  %v3758_v20 = vsub.f32 0.0, %v3748_v14  ;;  %v3762_v21 = vmul.f32 1.442695, %v3759_v49 }
0x22db   :  { %v3760_v22 = vmul.f32 1.442695, %v3758_v20  ;;  %4713 = vpow2.f32 %v3762_v21 }
0x22dd   :  { %4715 = vpow2.f32 %v3760_v22 }
0x22e4   :  { %v4710_v15 = vpop.eup %4709 }
0x22e5   :  { %3786 = vrot.lane.b32.xlu0 %v4710_v15, %s4745_s30 }
0x22e6   :  { %v4712_v34 = vpop.eup %4711 }
0x22e7   :  { %3784 = vrot.lane.b32.xlu1 %v4712_v34, %s4745_s30 }
0x22e8   :  { %v4714_v23 = vpop.eup %4713 }
0x22e9   :  { %3776 = vrot.lane.b32.xlu0 %v3757_v17, %s4744_s29  ;;  %v3765_v25 = vadd.f32 1.0, %v4714_v23 }
0x22ea   :  { %v4716_v24 = vpop.eup %4715 }
0x22eb   :  { %3774 = vrot.lane.b32.xlu1 %v3756_v19, %s4744_s29  ;;  %v3764_v26 = vadd.f32 1.0, %v4716_v24  ;;  %4717 = vrcp.f32 %v3765_v25 }
0x22ed   :  { %4719 = vrcp.f32 %v3764_v26 }
0x22f8   :  { %v4718_v27 = vpop.eup %4717 }
0x22fa   :  { %v4720_v8 = vpop.eup %4719 }
0x2357   :  { %v3787_v28 = vpop.permute.xlu0 %3786 }
0x2358   :  { %v3791_v29 = vmul.f32 %v4718_v27, %v3787_v28 }
0x2359   :  { %v3785_v30 = vpop.permute.xlu1 %3784 }
0x235a   :  { %v3790_v31 = vmul.f32 %v4720_v8, %v3785_v30  ;;  %3796 = vrot.lane.b32.xlu0 %v3791_v29, %s4744_s29 }
0x235b   :  { %v3777_v32 = vpop.permute.xlu0 %3776 }
0x235c   :  { %3794 = vrot.lane.b32.xlu1 %v3790_v31, %s4744_s29  ;;  %v3781_v4 = vmul.f32 %v4718_v27, %v3777_v32 }
0x235d   :  { %v3775_v33 = vpop.permute.xlu1 %3774 }
0x235e   :  { %v3780_v7 = vmul.f32 %v4720_v8, %v3775_v33 }
0x23cc   :  { %v3797_v35 = vpop.permute.xlu0 %3796 }
0x23cd   :  { %v3801_v36 = vadd.f32 %v3797_v35, %v3781_v4 }
0x23ce   :  { %v3795_v37 = vpop.permute.xlu1 %3794 }
0x23cf   :  { %4721 = vtanh.f32 %v3801_v36  ;;  %v3800_v38 = vadd.f32 %v3795_v37, %v3780_v7 }
0x23d1   :  { %4723 = vtanh.f32 %v3800_v38 }
0x23dc   :  { %v4722_v39 = vpop.eup %4721 }
0x23dd   :  { %3808 = vrot.lane.b32.xlu0 %v4722_v39, %s4744_s29 }
0x23de   :  { %v4724_v40 = vpop.eup %4723 }
0x23df   :  { %3806 = vrot.lane.b32.xlu1 %v4724_v40, %s4744_s29 }
0x244f   :  { %v3809_v41 = vpop.permute.xlu0 %3808 }
0x2450   :  { %v3813_v42 = vmul.f32 %v4718_v27, %v3809_v41 }
0x2451   :  { %v3807_v43 = vpop.permute.xlu1 %3806 }
0x2452   :  { %v3812_v44 = vmul.f32 %v4720_v8, %v3807_v43  ;;  %3818 = vrot.lane.b32.xlu0 %v3813_v42, %s4746_s15 }
0x2454   :  { %3816 = vrot.lane.b32.xlu1 %v3812_v44, %s4746_s15 }
0x2456   :  { %3826 = vrot.lane.b32.xlu0 %v3800_v38, %s4747_s16 }
0x2458   :  { %3828 = vrot.lane.b32.xlu1 %v3801_v36, %s4747_s16 }
0x24c4   :  { %v3819_v45 = vpop.permute.xlu0 %3818 }
0x24c5   :  { %3823 = vst.msk [vmem:[#allocation4 + $0x8] sm:$0xff] %vm43_vm1, %v3819_v45  ;;  %4180 = vst.msk [vmem:[%s5324_s11 + $0x38] sm:$0xff] %vm43_vm1, %v3819_v45 }
0x24c6   :  { %v3817_v46 = vpop.permute.xlu1 %3816 }
0x24c7   :  { %3822 = vst.msk [vmem:[#allocation4] sm:$0xff] %vm43_vm1, %v3817_v46  ;;  %4179 = vst.msk [vmem:[%s5324_s11 + $0x30] sm:$0xff] %vm43_vm1, %v3817_v46 }
0x24c8   :  { %v3827_v47 = vpop.permute.xlu0 %3826 }
0x24c9   :  { %3832 = vst.msk [vmem:[#allocation5] sm:$0xff] %vm43_vm1, %v3827_v47 }
0x24ca   :  { %v3829_v48 = vpop.permute.xlu1 %3828 }
0x24cb   :  { %3833 = vst.msk [vmem:[#allocation5 + $0x8] sm:$0xff] %vm43_vm1, %v3829_v48 }
0x24cc   :  { %v3838_v50 = vld [vmem:[#allocation4 + $0x8] sm:$0xff] }
0x24cd   :  { %4544 = vmatprep.subr.mxu1 %v3838_v50 }
0x24ce   :  { %4545 = vmatpush3.msra.mxu1 %v3838_v50  ;;  %v3837_v16 = vld [vmem:[#allocation4] sm:$0xff] }
0x24cf   :  { %4546 = vmatprep.subr.mxu1 %v3837_v16 }
0x24d0   :  { %4547 = vmatpush3.msra.mxu1 %v3837_v16  ;;  %v3995_v60 = vld [vmem:[#allocation5] sm:$0xff] }
0x24d1   :  { %4549 = vmatmul.mubr.msk.f32.vlgmr.msra.gmra.mxu1 %vm50_vm0, %v5099_v18 }
0x24d2   :  { %v3996_v18 = vld [vmem:[#allocation5 + $0x8] sm:$0xff] }
0x2591   :  { %v4550_v51 = vpop.f32.mrf.mxu1 }
0x2593   :  { %v3905_v52 = vpop.f32.mrf.mxu1 }
0x2594   :  { %4553 = vmatprep.mubr.msk.f32.mxu0 %vm43_vm1, %v3905_v52 }
0x2595   :  { %4554 = vmatmul.mubr.msk.f32.vlgmr.msra.gmra.mxu0 %vm43_vm1, %v4550_v51 }
0x2655   :  { %v4555_v53 = vpop.f32.mrf.mxu0 }
0x2656   :  { %v3992_v54 = vadd.f32 %v4555_v53, %v5152_v2 }
0x2657   :  { %v3986_v55 = vpop.f32.mrf.mxu0 }
0x2658   :  { %4725 = vtanh.f32 %v3992_v54  ;;  %v3987_v56 = vadd.f32 %v3986_v55, %v5154_v57  ;;  %v3998_v61 = vsub.f32 0.0, %v3992_v54 }
0x265a   :  { %4727 = vtanh.f32 %v3987_v56  ;;  %v3997_v62 = vsub.f32 0.0, %v3987_v56  ;;  %v4001_v2 = vmul.f32 1.442695, %v3998_v61 }
0x265c   :  { %v3999_v63 = vmul.f32 1.442695, %v3997_v62  ;;  %4729 = vpow2.f32 %v4001_v2 }
0x265e   :  { %4731 = vpow2.f32 %v3999_v63 }
0x2665   :  { %v4726_v58 = vpop.eup %4725 }
0x2666   :  { %4025 = vrot.lane.b32.xlu1 %v4726_v58, %s4745_s30 }
0x2667   :  { %v4728_v59 = vpop.eup %4727 }
0x2668   :  { %4023 = vrot.lane.b32.xlu0 %v4728_v59, %s4745_s30 }
0x2669   :  { %v4730_v57 = vpop.eup %4729 }
0x266a   :  { %4015 = vrot.lane.b32.xlu1 %v3996_v18, %s4744_s29  ;;  %v4004_v1 = vadd.f32 1.0, %v4730_v57 }
0x266b   :  { %v4732_v0 = vpop.eup %4731 }
0x266c   :  { %4013 = vrot.lane.b32.xlu0 %v3995_v60, %s4744_s29  ;;  %v4003_v3 = vadd.f32 1.0, %v4732_v0  ;;  %4733 = vrcp.f32 %v4004_v1 }
0x266e   :  { %4735 = vrcp.f32 %v4003_v3 }
0x2679   :  { %v4734_v5 = vpop.eup %4733 }
0x267b   :  { %v4736_v10 = vpop.eup %4735 }
0x26d8   :  { %v4026_v6 = vpop.permute.xlu1 %4025 }
0x26d9   :  { %v4030_v9 = vmul.f32 %v4734_v5, %v4026_v6 }
0x26da   :  { %v4024_v11 = vpop.permute.xlu0 %4023 }
0x26db   :  { %v4029_v12 = vmul.f32 %v4736_v10, %v4024_v11  ;;  %4035 = vrot.lane.b32.xlu1 %v4030_v9, %s4744_s29 }
0x26dc   :  { %v4016_v13 = vpop.permute.xlu1 %4015 }
0x26dd   :  { %4033 = vrot.lane.b32.xlu0 %v4029_v12, %s4744_s29  ;;  %v4020_v15 = vmul.f32 %v4734_v5, %v4016_v13 }
0x26de   :  { %v4014_v14 = vpop.permute.xlu0 %4013 }
0x26df   :  { %v4019_v17 = vmul.f32 %v4736_v10, %v4014_v14 }
0x274d   :  { %v4036_v34 = vpop.permute.xlu1 %4035 }
0x274e   :  { %v4040_v19 = vadd.f32 %v4036_v34, %v4020_v15 }
0x274f   :  { %v4034_v49 = vpop.permute.xlu0 %4033 }
0x2750   :  { %4737 = vtanh.f32 %v4040_v19  ;;  %v4039_v20 = vadd.f32 %v4034_v49, %v4019_v17 }
0x2752   :  { %4739 = vtanh.f32 %v4039_v20 }
0x275d   :  { %v4738_v21 = vpop.eup %4737 }
0x275e   :  { %4047 = vrot.lane.b32.xlu1 %v4738_v21, %s4744_s29 }
0x275f   :  { %v4740_v22 = vpop.eup %4739 }
0x2760   :  { %4045 = vrot.lane.b32.xlu0 %v4740_v22, %s4744_s29 }
0x27d0   :  { %v4048_v23 = vpop.permute.xlu1 %4047 }
0x27d1   :  { %v4052_v24 = vmul.f32 %v4734_v5, %v4048_v23 }
0x27d2   :  { %v4046_v25 = vpop.permute.xlu0 %4045 }
0x27d3   :  { %v4051_v26 = vmul.f32 %v4736_v10, %v4046_v25  ;;  %4057 = vrot.lane.b32.xlu1 %v4052_v24, %s4746_s15 }
0x27d5   :  { %4055 = vrot.lane.b32.xlu0 %v4051_v26, %s4746_s15 }
0x27d7   :  { %4067 = vrot.lane.b32.xlu1 %v4040_v19, %s4747_s16 }
0x27d9   :  { %4065 = vrot.lane.b32.xlu0 %v4039_v20, %s4747_s16 }
0x2845   :  { %v4058_v27 = vpop.permute.xlu1 %4057 }
0x2846   :  { %4062 = vst.msk [vmem:[#allocation4 + $0x8] sm:$0xff] %vm43_vm1, %v4058_v27  ;;  %4186 = vst.msk [vmem:[%s5324_s11 + $0x48] sm:$0xff] %vm43_vm1, %v4058_v27 }
0x2847   :  { %v4056_v28 = vpop.permute.xlu0 %4055 }
0x2848   :  { %4061 = vst.msk [vmem:[#allocation4] sm:$0xff] %vm43_vm1, %v4056_v28  ;;  %4185 = vst.msk [vmem:[%s5324_s11 + $0x40] sm:$0xff] %vm43_vm1, %v4056_v28 }
0x2849   :  { %v4068_v29 = vpop.permute.xlu1 %4067 }
0x284a   :  { %4072 = vst.msk [vmem:[#allocation5 + $0x8] sm:$0xff] %vm43_vm1, %v4068_v29 }
0x284b   :  { %v4066_v8 = vpop.permute.xlu0 %4065 }
0x284c   :  { %4071 = vst.msk [vmem:[#allocation5] sm:$0xff] %vm43_vm1, %v4066_v8 }

</bundles_post_ra>
